<compile_context>
chip_gen: v6e
topology: v6e:2x2x1
jax: 0.10.0
libtpu: 0.0.40
codegen_flags: <defaults>
</compile_context>

<pallas_src>
import jax
import jax.numpy as jnp
from jax.experimental import pallas as pl
from jax.experimental.pallas import tpu as pltpu


# ------------------------------ fused kernel --------------------------------

def fused_kernel(p_ref, w1_ref, b1_ref, w2_ref, b2_ref,
                 wf1_ref, bf1_ref, wf2_ref, bf2_ref, o_ref):
    Bblk = o_ref.shape[0]          # batch rows handled this grid step
    R = 4 * Bblk                   # rows per pool-offset group (4 pooled pos * Bblk)

    # conv1 at all 16 positions feeding the 2x2 maxpool as ONE matmul.
    # P rows are d-major: (d = in-window offset, s = pooled position, b = batch).
    p = p_ref[0]                                                       # (4*R, 208) bf16
    h1 = jnp.dot(p, w1_ref[...], preferred_element_type=jnp.float32)  # (4*R, 800)

    # 2x2 maxpool = max over the 4 sublane-aligned R-row d-slices.
    # Bias is offset-independent and max is monotone -> add once after the max.
    m01 = jnp.maximum(h1[0 * R:1 * R], h1[1 * R:2 * R])
    m23 = jnp.maximum(h1[2 * R:3 * R], h1[3 * R:4 * R])
    pooled = jnp.maximum(jnp.maximum(m01, m23) + b1_ref[...], 0.0)    # (R, 800)

    # 1x1 conv2 + relu
    h2 = jnp.maximum(
        jnp.dot(pooled.astype(jnp.bfloat16), w2_ref[...],
                preferred_element_type=jnp.float32) + b2_ref[...],
        0.0)                                                          # (R, 400)

    # fc1: NCHW flatten folded into wf1 -> sum of per-position (Bblk,400)@(400,100)
    acc = jnp.zeros((Bblk, 100), jnp.float32)
    for s in range(4):                                                # unrolled
        acc = acc + jnp.dot(h2[s * Bblk:(s + 1) * Bblk, :].astype(jnp.bfloat16),
                            wf1_ref[s], preferred_element_type=jnp.float32)
    h3 = jnp.maximum(acc + bf1_ref[...], 0.0)                         # (Bblk, 100)

    # fc2 + relu (the PyTorch model applies relu to the logits)
    logits = jnp.maximum(
        jnp.dot(h3.astype(jnp.bfloat16), wf2_ref[...],
                preferred_element_type=jnp.float32) + bf2_ref[...],
        0.0)                                                          # (Bblk, 3)

    # log_softmax (f32, max-subtracted, numerically stable)
    m = jnp.max(logits, axis=-1, keepdims=True)
    e = jnp.exp(logits - m)
    lse = jnp.log(jnp.sum(e, axis=-1, keepdims=True)) + m
    o_ref[...] = logits - lse


# ------------------------------ parameters ----------------------------------

def init_params(key):
    ks = jax.random.split(key, 8)

    def u(k, shape, fan_in):
        bound = 1.0 / jnp.sqrt(jnp.float32(fan_in))
        return jax.random.uniform(k, shape, jnp.float32, -bound, bound)

    # PyTorch layouts first, then convert to matmul layouts.
    w1_t = u(ks[0], (800, 13, 4, 4), 13 * 4 * 4)   # Conv2d(13, 800, k=4)
    b1 = u(ks[1], (800,), 13 * 4 * 4)
    w2_t = u(ks[2], (400, 800, 1, 1), 800)         # Conv2d(800, 400, k=1)
    b2 = u(ks[3], (400,), 800)
    wf1_t = u(ks[4], (100, 1600), 1600)            # Linear(1600, 100)
    bf1 = u(ks[5], (100,), 1600)
    wf2_t = u(ks[6], (3, 100), 100)                # Linear(100, 3)
    bf2 = u(ks[7], (3,), 100)

    # conv1 weight rows ordered (kh, kw, cin) to match the im2col patch order
    w1 = jnp.transpose(w1_t, (2, 3, 1, 0)).reshape(4 * 4 * 13, 800)
    # 1x1 conv2 as (800, 400) matmul weight
    w2 = w2_t.reshape(400, 800).T
    # fc1: fold the NCHW flatten (feature idx = c*4 + s) into the weight:
    #   wf1_r[s, c, :] = Wf1_pt.T[c*4 + s, :]
    wf1 = wf1_t.T                                        # (1600, 100)
    wf1_r = wf1.reshape(400, 4, 100).transpose(1, 0, 2)  # (4, 400, 100)
    wf2 = wf2_t.T                                        # (100, 3)

    return dict(
        w1=w1.astype(jnp.bfloat16),     b1=b1.reshape(1, 800),
        w2=w2.astype(jnp.bfloat16),     b2=b2.reshape(1, 400),
        wf1=wf1_r.astype(jnp.bfloat16), bf1=bf1.reshape(1, 100),
        wf2=wf2.astype(jnp.bfloat16),   bf2=bf2.reshape(1, 3),
    )


# ------------------------------ forward --------------------------------------

def forward(params, x_nchw, block_b=128):
    B = x_nchw.shape[0]
    x = jnp.transpose(x_nchw, (0, 2, 3, 1)).astype(jnp.bfloat16)   # NHWC (B, 8, 8, 13)
    K, C = 4, x.shape[3]

    # batch tiling: Bblk rows per grid step, multiple of 8 (sublane alignment)
    Bblk = min(block_b, ((B + 7) // 8) * 8)
    Bblk = ((Bblk + 7) // 8) * 8
    NB = -(-B // Bblk)
    Bpad = NB * Bblk
    x = jnp.pad(x, ((0, Bpad - B), (0, 0), (0, 0), (0, 0)))

    # im2col for the 16 conv-output positions feeding the 2x2 maxpool.
    # d = (di, dj) is the offset inside the pool window, s = pi*2+pj the pooled
    # position.  Patch feature order is (kh, kw, cin), matching w1's row order.
    groups = []
    for di in range(2):
        for dj in range(2):
            rows = []
            for pi in range(2):
                for pj in range(2):
                    oh, ow = 2 * pi + di, 2 * pj + dj
                    rows.append(
                        x[:, oh:oh + K, ow:ow + K, :].reshape(Bpad, K * K * C))
            groups.append(jnp.stack(rows, axis=0))      # (4, Bpad, 208): (s, b)
    P = jnp.stack(groups, axis=0)                       # (4, 4, Bpad, 208): (d, s, b)
    # split batch into blocks, block index leading; rows per block are (d, s, b_loc)
    P = P.reshape(4, 4, NB, Bblk, K * K * C).transpose(2, 0, 1, 3, 4)
    P = P.reshape(NB, 16 * Bblk, K * K * C)             # (NB, 16*Bblk, 208) bf16

    args = (P, params["w1"], params["b1"], params["w2"], params["b2"],
            params["wf1"], params["bf1"], params["wf2"], params["bf2"])

    in_specs = [
        pl.BlockSpec((1, 16 * Bblk, K * K * C), lambda i: (i, 0, 0)),  # P (per block)
        pl.BlockSpec((K * K * C, 800), lambda i: (0, 0)),              # w1 (resident)
        pl.BlockSpec((1, 800),         lambda i: (0, 0)),              # b1
        pl.BlockSpec((800, 400),       lambda i: (0, 0)),              # w2
        pl.BlockSpec((1, 400),         lambda i: (0, 0)),              # b2
        pl.BlockSpec((4, 400, 100),    lambda i: (0, 0, 0)),           # wf1
        pl.BlockSpec((1, 100),         lambda i: (0, 0)),              # bf1
        pl.BlockSpec((100, 3),         lambda i: (0, 0)),              # wf2
        pl.BlockSpec((1, 3),           lambda i: (0, 0)),              # bf2
    ]
    out_specs = pl.BlockSpec((Bblk, 3), lambda i: (i, 0))

    out_pad = pl.pallas_call(
        fused_kernel,
        grid=(NB,),
        out_shape=jax.ShapeDtypeStruct((Bpad, 3), jnp.float32),
        in_specs=in_specs,
        out_specs=out_specs,
        compiler_params=pltpu.CompilerParams(
            dimension_semantics=("parallel",)),   # v7x megacore over batch blocks
    )(*args)

    return out_pad[:B, :]


if __name__ == "__main__":
    key = jax.random.PRNGKey(0)
    pkey, xkey = jax.random.split(key)
    params = init_params(pkey)
    # input: batch=2, channels=13, spatial=8x8 (gives 400*2*2 = 1600 fc1 features)
    x = jax.random.normal(xkey, (2, 13, 8, 8), dtype=jnp.float32)

    out = jax.jit(forward)(params, x)
    out = jax.block_until_ready(out)

    assert out.shape == (2, 3)
    assert bool(jnp.all(jnp.isfinite(out)))
    # log_softmax rows should exponentiate-sum to ~1
    assert bool(jnp.allclose(jnp.sum(jnp.exp(out), axis=1), 1.0, atol=1e-4))
    print("KERNEL_OK")
</pallas_src>

<mosaic_0001>
module attributes {stable_mosaic.version = 11 : i64} {
  func.func @fused_kernel(%arg0: i32, %arg1: memref<1x128x208xbf16, #tpu.memory_space<vmem>>, %arg2: memref<208x800xbf16, #tpu.memory_space<vmem>>, %arg3: memref<1x800xf32, #tpu.memory_space<vmem>>, %arg4: memref<800x400xbf16, #tpu.memory_space<vmem>>, %arg5: memref<1x400xf32, #tpu.memory_space<vmem>>, %arg6: memref<4x400x100xbf16, #tpu.memory_space<vmem>>, %arg7: memref<1x100xf32, #tpu.memory_space<vmem>>, %arg8: memref<100x3xbf16, #tpu.memory_space<vmem>>, %arg9: memref<1x3xf32, #tpu.memory_space<vmem>>, %arg10: memref<8x3xf32, #tpu.memory_space<vmem>>) attributes {dimension_semantics = [#tpu.dimension_semantics<parallel>], iteration_bounds = array<i64: 1>, scalar_prefetch = 0 : i64, scratch_operands = 0 : i64, tpu.core_type = #tpu.core_type<tc>, window_params = [{transform_indices = @transform_0, window_bounds = array<i64: 1, 128, 208>}, {pipeline_mode = #tpu.pipeline_mode<synchronous>, transform_indices = @transform_1, window_bounds = array<i64: 208, 800>}, {pipeline_mode = #tpu.pipeline_mode<synchronous>, transform_indices = @transform_2, window_bounds = array<i64: 1, 800>}, {pipeline_mode = #tpu.pipeline_mode<synchronous>, transform_indices = @transform_3, window_bounds = array<i64: 800, 400>}, {pipeline_mode = #tpu.pipeline_mode<synchronous>, transform_indices = @transform_4, window_bounds = array<i64: 1, 400>}, {pipeline_mode = #tpu.pipeline_mode<synchronous>, transform_indices = @transform_5, window_bounds = array<i64: 4, 400, 100>}, {pipeline_mode = #tpu.pipeline_mode<synchronous>, transform_indices = @transform_6, window_bounds = array<i64: 1, 100>}, {pipeline_mode = #tpu.pipeline_mode<synchronous>, transform_indices = @transform_7, window_bounds = array<i64: 100, 3>}, {pipeline_mode = #tpu.pipeline_mode<synchronous>, transform_indices = @transform_8, window_bounds = array<i64: 1, 3>}, {transform_indices = @transform_9, window_bounds = array<i64: 8, 3>}]} {
    %c0 = arith.constant 0 : index
    %c0_0 = arith.constant 0 : index
    %c0_1 = arith.constant 0 : index
    %0 = vector.load %arg1[%c0, %c0_0, %c0_1] : memref<1x128x208xbf16, #tpu.memory_space<vmem>>, vector<1x128x208xbf16>
    %1 = vector.shape_cast %0 : vector<1x128x208xbf16> to vector<128x208xbf16>
    %c0_2 = arith.constant 0 : index
    %c0_3 = arith.constant 0 : index
    %2 = vector.load %arg2[%c0_2, %c0_3] : memref<208x800xbf16, #tpu.memory_space<vmem>>, vector<208x800xbf16>
    %cst = arith.constant dense<0.000000e+00> : vector<128x800xf32>
    %3 = tpu.matmul %1, %2, %cst {dimension_numbers = #tpu.dot_dimension_numbers<[1], [0], [0], [1], [0, 0, 1, 1], [], []>} : vector<128x208xbf16>, vector<208x800xbf16>, vector<128x800xf32> -> vector<128x800xf32>
    %4 = vector.extract_strided_slice %3 {offsets = [0, 0], sizes = [32, 800], strides = [1, 1]} : vector<128x800xf32> to vector<32x800xf32>
    %5 = vector.extract_strided_slice %3 {offsets = [32, 0], sizes = [32, 800], strides = [1, 1]} : vector<128x800xf32> to vector<32x800xf32>
    %6 = arith.maximumf %4, %5 : vector<32x800xf32>
    %7 = vector.extract_strided_slice %3 {offsets = [64, 0], sizes = [32, 800], strides = [1, 1]} : vector<128x800xf32> to vector<32x800xf32>
    %8 = vector.extract_strided_slice %3 {offsets = [96, 0], sizes = [32, 800], strides = [1, 1]} : vector<128x800xf32> to vector<32x800xf32>
    %9 = arith.maximumf %7, %8 : vector<32x800xf32>
    %10 = arith.maximumf %6, %9 : vector<32x800xf32>
    %c0_4 = arith.constant 0 : index
    %c0_5 = arith.constant 0 : index
    %11 = vector.load %arg3[%c0_4, %c0_5] : memref<1x800xf32, #tpu.memory_space<vmem>>, vector<1x800xf32>
    %12 = vector.broadcast %11 : vector<1x800xf32> to vector<32x800xf32>
    %13 = arith.addf %10, %12 : vector<32x800xf32>
    %cst_6 = arith.constant 0.000000e+00 : f32
    %14 = vector.broadcast %cst_6 : f32 to vector<32x800xf32>
    %15 = arith.maximumf %13, %14 : vector<32x800xf32>
    %16 = arith.truncf %15 : vector<32x800xf32> to vector<32x800xbf16>
    %c0_7 = arith.constant 0 : index
    %c0_8 = arith.constant 0 : index
    %17 = vector.load %arg4[%c0_7, %c0_8] : memref<800x400xbf16, #tpu.memory_space<vmem>>, vector<800x400xbf16>
    %cst_9 = arith.constant dense<0.000000e+00> : vector<32x400xf32>
    %18 = tpu.matmul %16, %17, %cst_9 {dimension_numbers = #tpu.dot_dimension_numbers<[1], [0], [0], [1], [0, 0, 1, 1], [], []>} : vector<32x800xbf16>, vector<800x400xbf16>, vector<32x400xf32> -> vector<32x400xf32>
    %c0_10 = arith.constant 0 : index
    %c0_11 = arith.constant 0 : index
    %19 = vector.load %arg5[%c0_10, %c0_11] : memref<1x400xf32, #tpu.memory_space<vmem>>, vector<1x400xf32>
    %20 = vector.broadcast %19 : vector<1x400xf32> to vector<32x400xf32>
    %21 = arith.addf %18, %20 : vector<32x400xf32>
    %cst_12 = arith.constant 0.000000e+00 : f32
    %22 = vector.broadcast %cst_12 : f32 to vector<32x400xf32>
    %23 = arith.maximumf %21, %22 : vector<32x400xf32>
    %cst_13 = arith.constant 0.000000e+00 : f32
    %24 = vector.broadcast %cst_13 : f32 to vector<8x100xf32>
    %25 = vector.extract_strided_slice %23 {offsets = [0, 0], sizes = [8, 400], strides = [1, 1]} : vector<32x400xf32> to vector<8x400xf32>
    %26 = arith.truncf %25 : vector<8x400xf32> to vector<8x400xbf16>
    %c0_14 = arith.constant 0 : index
    %c0_15 = arith.constant 0 : index
    %c0_16 = arith.constant 0 : index
    %27 = vector.load %arg6[%c0_14, %c0_15, %c0_16] : memref<4x400x100xbf16, #tpu.memory_space<vmem>>, vector<1x400x100xbf16>
    %28 = vector.shape_cast %27 : vector<1x400x100xbf16> to vector<400x100xbf16>
    %cst_17 = arith.constant dense<0.000000e+00> : vector<8x100xf32>
    %29 = tpu.matmul %26, %28, %cst_17 {dimension_numbers = #tpu.dot_dimension_numbers<[1], [0], [0], [1], [0, 0, 1, 1], [], []>} : vector<8x400xbf16>, vector<400x100xbf16>, vector<8x100xf32> -> vector<8x100xf32>
    %30 = arith.addf %24, %29 : vector<8x100xf32>
    %31 = vector.extract_strided_slice %23 {offsets = [8, 0], sizes = [8, 400], strides = [1, 1]} : vector<32x400xf32> to vector<8x400xf32>
    %32 = arith.truncf %31 : vector<8x400xf32> to vector<8x400xbf16>
    %c1 = arith.constant 1 : index
    %c0_18 = arith.constant 0 : index
    %c0_19 = arith.constant 0 : index
    %33 = vector.load %arg6[%c1, %c0_18, %c0_19] : memref<4x400x100xbf16, #tpu.memory_space<vmem>>, vector<1x400x100xbf16>
    %34 = vector.shape_cast %33 : vector<1x400x100xbf16> to vector<400x100xbf16>
    %cst_20 = arith.constant dense<0.000000e+00> : vector<8x100xf32>
    %35 = tpu.matmul %32, %34, %cst_20 {dimension_numbers = #tpu.dot_dimension_numbers<[1], [0], [0], [1], [0, 0, 1, 1], [], []>} : vector<8x400xbf16>, vector<400x100xbf16>, vector<8x100xf32> -> vector<8x100xf32>
    %36 = arith.addf %30, %35 : vector<8x100xf32>
    %37 = vector.extract_strided_slice %23 {offsets = [16, 0], sizes = [8, 400], strides = [1, 1]} : vector<32x400xf32> to vector<8x400xf32>
    %38 = arith.truncf %37 : vector<8x400xf32> to vector<8x400xbf16>
    %c2 = arith.constant 2 : index
    %c0_21 = arith.constant 0 : index
    %c0_22 = arith.constant 0 : index
    %39 = vector.load %arg6[%c2, %c0_21, %c0_22] : memref<4x400x100xbf16, #tpu.memory_space<vmem>>, vector<1x400x100xbf16>
    %40 = vector.shape_cast %39 : vector<1x400x100xbf16> to vector<400x100xbf16>
    %cst_23 = arith.constant dense<0.000000e+00> : vector<8x100xf32>
    %41 = tpu.matmul %38, %40, %cst_23 {dimension_numbers = #tpu.dot_dimension_numbers<[1], [0], [0], [1], [0, 0, 1, 1], [], []>} : vector<8x400xbf16>, vector<400x100xbf16>, vector<8x100xf32> -> vector<8x100xf32>
    %42 = arith.addf %36, %41 : vector<8x100xf32>
    %43 = vector.extract_strided_slice %23 {offsets = [24, 0], sizes = [8, 400], strides = [1, 1]} : vector<32x400xf32> to vector<8x400xf32>
    %44 = arith.truncf %43 : vector<8x400xf32> to vector<8x400xbf16>
    %c3 = arith.constant 3 : index
    %c0_24 = arith.constant 0 : index
    %c0_25 = arith.constant 0 : index
    %45 = vector.load %arg6[%c3, %c0_24, %c0_25] : memref<4x400x100xbf16, #tpu.memory_space<vmem>>, vector<1x400x100xbf16>
    %46 = vector.shape_cast %45 : vector<1x400x100xbf16> to vector<400x100xbf16>
    %cst_26 = arith.constant dense<0.000000e+00> : vector<8x100xf32>
    %47 = tpu.matmul %44, %46, %cst_26 {dimension_numbers = #tpu.dot_dimension_numbers<[1], [0], [0], [1], [0, 0, 1, 1], [], []>} : vector<8x400xbf16>, vector<400x100xbf16>, vector<8x100xf32> -> vector<8x100xf32>
    %48 = arith.addf %42, %47 : vector<8x100xf32>
    %c0_27 = arith.constant 0 : index
    %c0_28 = arith.constant 0 : index
    %49 = vector.load %arg7[%c0_27, %c0_28] : memref<1x100xf32, #tpu.memory_space<vmem>>, vector<1x100xf32>
    %50 = vector.broadcast %49 : vector<1x100xf32> to vector<8x100xf32>
    %51 = arith.addf %48, %50 : vector<8x100xf32>
    %cst_29 = arith.constant 0.000000e+00 : f32
    %52 = vector.broadcast %cst_29 : f32 to vector<8x100xf32>
    %53 = arith.maximumf %51, %52 : vector<8x100xf32>
    %54 = arith.truncf %53 : vector<8x100xf32> to vector<8x100xbf16>
    %c0_30 = arith.constant 0 : index
    %c0_31 = arith.constant 0 : index
    %55 = vector.load %arg8[%c0_30, %c0_31] : memref<100x3xbf16, #tpu.memory_space<vmem>>, vector<100x3xbf16>
    %cst_32 = arith.constant dense<0.000000e+00> : vector<8x3xf32>
    %56 = tpu.matmul %54, %55, %cst_32 {dimension_numbers = #tpu.dot_dimension_numbers<[1], [0], [0], [1], [0, 0, 1, 1], [], []>} : vector<8x100xbf16>, vector<100x3xbf16>, vector<8x3xf32> -> vector<8x3xf32>
    %c0_33 = arith.constant 0 : index
    %c0_34 = arith.constant 0 : index
    %57 = vector.load %arg9[%c0_33, %c0_34] : memref<1x3xf32, #tpu.memory_space<vmem>>, vector<1x3xf32>
    %58 = vector.broadcast %57 : vector<1x3xf32> to vector<8x3xf32>
    %59 = arith.addf %56, %58 : vector<8x3xf32>
    %cst_35 = arith.constant 0.000000e+00 : f32
    %60 = vector.broadcast %cst_35 : f32 to vector<8x3xf32>
    %61 = arith.maximumf %59, %60 : vector<8x3xf32>
    %cst_36 = arith.constant dense<0xFF800000> : vector<8xf32>
    %62 = vector.multi_reduction <maximumf>, %61, %cst_36 [1] : vector<8x3xf32> to vector<8xf32>
    %63 = vector.shape_cast %62 : vector<8xf32> to vector<8x1xf32>
    %64 = vector.broadcast %63 : vector<8x1xf32> to vector<8x3xf32>
    %65 = arith.subf %61, %64 : vector<8x3xf32>
    %66 = math.exp %65 : vector<8x3xf32>
    %cst_37 = arith.constant dense<0.000000e+00> : vector<8xf32>
    %67 = vector.multi_reduction <add>, %66, %cst_37 [1] : vector<8x3xf32> to vector<8xf32>
    %68 = vector.shape_cast %67 : vector<8xf32> to vector<8x1xf32>
    %69 = math.log %68 : vector<8x1xf32>
    %70 = arith.addf %69, %63 : vector<8x1xf32>
    %71 = vector.broadcast %70 : vector<8x1xf32> to vector<8x3xf32>
    %72 = arith.subf %61, %71 : vector<8x3xf32>
    %c0_38 = arith.constant 0 : index
    %c0_39 = arith.constant 0 : index
    %73 = vector.load %arg10[%c0_38, %c0_39] : memref<8x3xf32, #tpu.memory_space<vmem>>, vector<8x3xf32>
    tpu.vector_store %arg10[%c0_38, %c0_39], %72 {strides = array<i32>} : memref<8x3xf32, #tpu.memory_space<vmem>>, vector<8x3xf32>,
    return
  }
  func.func @transform_0(%arg0: i32) -> (i32, i32, i32) {
    %c0_i32 = arith.constant 0 : i32
    %c0_i32_0 = arith.constant 0 : i32
    %c0_i32_1 = arith.constant 0 : i32
    return %arg0, %c0_i32, %c0_i32_0 : i32, i32, i32
  }
  func.func @transform_1(%arg0: i32) -> (i32, i32) {
    %c0_i32 = arith.constant 0 : i32
    %c0_i32_0 = arith.constant 0 : i32
    %c0_i32_1 = arith.constant 0 : i32
    return %c0_i32, %c0_i32_0 : i32, i32
  }
  func.func @transform_2(%arg0: i32) -> (i32, i32) {
    %c0_i32 = arith.constant 0 : i32
    %c0_i32_0 = arith.constant 0 : i32
    %c0_i32_1 = arith.constant 0 : i32
    return %c0_i32, %c0_i32_0 : i32, i32
  }
  func.func @transform_3(%arg0: i32) -> (i32, i32) {
    %c0_i32 = arith.constant 0 : i32
    %c0_i32_0 = arith.constant 0 : i32
    %c0_i32_1 = arith.constant 0 : i32
    return %c0_i32, %c0_i32_0 : i32, i32
  }
  func.func @transform_4(%arg0: i32) -> (i32, i32) {
    %c0_i32 = arith.constant 0 : i32
    %c0_i32_0 = arith.constant 0 : i32
    %c0_i32_1 = arith.constant 0 : i32
    return %c0_i32, %c0_i32_0 : i32, i32
  }
  func.func @transform_5(%arg0: i32) -> (i32, i32, i32) {
    %c0_i32 = arith.constant 0 : i32
    %c0_i32_0 = arith.constant 0 : i32
    %c0_i32_1 = arith.constant 0 : i32
    %c0_i32_2 = arith.constant 0 : i32
    return %c0_i32, %c0_i32_0, %c0_i32_1 : i32, i32, i32
  }
  func.func @transform_6(%arg0: i32) -> (i32, i32) {
    %c0_i32 = arith.constant 0 : i32
    %c0_i32_0 = arith.constant 0 : i32
    %c0_i32_1 = arith.constant 0 : i32
    return %c0_i32, %c0_i32_0 : i32, i32
  }
  func.func @transform_7(%arg0: i32) -> (i32, i32) {
    %c0_i32 = arith.constant 0 : i32
    %c0_i32_0 = arith.constant 0 : i32
    %c0_i32_1 = arith.constant 0 : i32
    return %c0_i32, %c0_i32_0 : i32, i32
  }
  func.func @transform_8(%arg0: i32) -> (i32, i32) {
    %c0_i32 = arith.constant 0 : i32
    %c0_i32_0 = arith.constant 0 : i32
    %c0_i32_1 = arith.constant 0 : i32
    return %c0_i32, %c0_i32_0 : i32, i32
  }
  func.func @transform_9(%arg0: i32) -> (i32, i32) {
    %c0_i32 = arith.constant 0 : i32
    %c0_i32_0 = arith.constant 0 : i32
    return %arg0, %c0_i32 : i32, i32
  }
}

</mosaic_0001>

<bundles_post_ra>
// kernel: forward.1
= control target key start
LH: loop header
LB: loop body
LE: loop exit
PB: predicated region body
PF: predicated region fallthrough
CT: control target
= control target key end

     0   :  { %vm693_vm0 = vcmask 654336   ;;  %v7571_v57 = vmov 0   ;;  %vm2567_vm1 = vcmask 261120   ;;  %vm3273_vm2 = vcmask 130048   ;;  %s7561_s1 = inlined_call_operand.vmem [shape: bf16[208,800], index: 1, kind: input, shape index: {}]   ;;  %s7562_s0 = inlined_call_operand.vmem [shape: bf16[1,128,208], index: 0, kind: input, shape index: {}]   ;;  %s7563_s3 = inlined_call_operand.vmem [shape: bf16[800,400], index: 3, kind: input, shape index: {}]   ;;  %s7564_s2 = inlined_call_operand.vmem [shape: f32[1,800], index: 2, kind: input, shape index: {}]   ;;  %s7565_s5 = inlined_call_operand.vmem [shape: bf16[4,400,100], index: 5, kind: input, shape index: {}]   ;;  %s7566_s4 = inlined_call_operand.vmem [shape: f32[1,400], index: 4, kind: input, shape index: {}]   ;;  %s7567_s7 = inlined_call_operand.vmem [shape: bf16[100,3], index: 7, kind: input, shape index: {}]   ;;  %s7568_s6 = inlined_call_operand.vmem [shape: f32[1,100], index: 6, kind: input, shape index: {}]   ;;  %s7569_s8 = inlined_call_operand.vmem [shape: f32[1,3], index: 8, kind: input, shape index: {}]   ;;  %s7570_s9 = inlined_call_operand.vmem [shape: f32[8,3], index: 9, kind: output, shape index: {}]  }
   0x1   :  { %v5029_v0 = vld [vmem:[%s7561_s1 + $0x18c] ss:$28 sps:$4 sm:$0xff]   ;;  %v5031_v1 = vld [vmem:[%s7561_s1 + $0x194] ss:$28 sps:$4 sm:$0xff]   ;;  %v5037_v5 = vld [vmem:[%s7561_s1 + $0x15c] ss:$28 sps:$4 sm:$0xff]  }
   0x2   :  { %718 = vmatprep.subr.bf16.mxu0 %v5029_v0  ;;  %v5033_v2 = vld [vmem:[%s7561_s1 + $0x188] ss:$28 sps:$4 sm:$0xff]   ;;  %v5034_v3 = vld [vmem:[%s7561_s1 + $0x190] ss:$28 sps:$4 sm:$0xff]   ;;  %831 = vmatprep.subr.bf16.mxu1 %v5031_v1  ;;  %v5040_v7 = vld [vmem:[%s7561_s1 + $0x158] ss:$28 sps:$4 sm:$0xff]  }
   0x3   :  { %v5035_v4 = vld [vmem:[%s7561_s1 + $0x154] ss:$28 sps:$4 sm:$0xff]   ;;  %719 = vmatpush1.bf16.msra.mxu0 %v5033_v2  ;;  %832 = vmatpush1.bf16.msra.mxu1 %v5034_v3  ;;  %v5041_v8 = vld [vmem:[%s7561_s1 + $0x11c] ss:$28 sps:$4 sm:$0xff]   ;;  %v5043_v9 = vld [vmem:[%s7561_s1 + $0x124] ss:$28 sps:$4 sm:$0xff]  }
   0x4   :  { %v5039_v6 = vld [vmem:[%s7561_s1 + $0x150] ss:$28 sps:$4 sm:$0xff]   ;;  %720 = vmatprep.subr.bf16.mxu0 %v5035_v4  ;;  %833 = vmatprep.subr.bf16.mxu1 %v5037_v5  ;;  %v5045_v10 = vld [vmem:[%s7561_s1 + $0x118] ss:$28 sps:$4 sm:$0xff]   ;;  %v5046_v11 = vld [vmem:[%s7561_s1 + $0x120] ss:$28 sps:$4 sm:$0xff]  }
   0x5   :  { %v5047_v12 = vld [vmem:[%s7561_s1 + $0xe4] ss:$28 sps:$4 sm:$0xff]   ;;  %v5049_v13 = vld [vmem:[%s7561_s1 + $0xec] ss:$28 sps:$4 sm:$0xff]   ;;  %v5055_v17 = vld [vmem:[%s7561_s1 + $0xb4] ss:$28 sps:$4 sm:$0xff]  }
   0x6   :  { %v5051_v14 = vld [vmem:[%s7561_s1 + $0xe0] ss:$28 sps:$4 sm:$0xff]   ;;  %v5052_v15 = vld [vmem:[%s7561_s1 + $0xe8] ss:$28 sps:$4 sm:$0xff]   ;;  %v5058_v19 = vld [vmem:[%s7561_s1 + $0xb0] ss:$28 sps:$4 sm:$0xff]  }
   0x7   :  { %721 = vmatpush1.bf16.msra.mxu0 %v5039_v6  ;;  %834 = vmatpush1.bf16.msra.mxu1 %v5040_v7  ;;  %v5053_v16 = vld [vmem:[%s7561_s1 + $0xac] ss:$28 sps:$4 sm:$0xff]   ;;  %v5059_v20 = vld [vmem:[%s7561_s1 + $0x74] ss:$28 sps:$4 sm:$0xff]   ;;  %v5061_v21 = vld [vmem:[%s7561_s1 + $0x7c] ss:$28 sps:$4 sm:$0xff]  }
   0x8   :  { %722 = vmatprep.subr.bf16.mxu0 %v5041_v8  ;;  %835 = vmatprep.subr.bf16.mxu1 %v5043_v9  ;;  %v5057_v18 = vld [vmem:[%s7561_s1 + $0xa8] ss:$28 sps:$4 sm:$0xff]   ;;  %v5063_v22 = vld [vmem:[%s7561_s1 + $0x70] ss:$28 sps:$4 sm:$0xff]   ;;  %v5064_v23 = vld [vmem:[%s7561_s1 + $0x78] ss:$28 sps:$4 sm:$0xff]  }
   0x9   :  { %v5065_v24 = vld [vmem:[%s7561_s1 + $0x3c] ss:$28 sps:$4 sm:$0xff]   ;;  %v5067_v25 = vld [vmem:[%s7561_s1 + $0x44] ss:$28 sps:$4 sm:$0xff]   ;;  %v5073_v29 = vld [vmem:[%s7561_s1 + $0xc] ss:$28 sps:$4 sm:$0xff]  }
   0xa   :  { %v5069_v26 = vld [vmem:[%s7561_s1 + $0x38] ss:$28 sps:$4 sm:$0xff]   ;;  %v5070_v27 = vld [vmem:[%s7561_s1 + $0x40] ss:$28 sps:$4 sm:$0xff]   ;;  %v5076_v31 = vld [vmem:[%s7561_s1 + $0x8] ss:$28 sps:$4 sm:$0xff]  }
   0xb   :  { %723 = vmatpush1.bf16.msra.mxu0 %v5045_v10  ;;  %836 = vmatpush1.bf16.msra.mxu1 %v5046_v11  ;;  %v5071_v28 = vld [vmem:[%s7561_s1 + $0x4] ss:$28 sps:$4 sm:$0xff]   ;;  %v5079_v33 = vld [vmem:[%s7561_s1 + $0x2ac] ss:$28 sps:$4 sm:$0xff]   ;;  %v5085_v37 = vld [vmem:[%s7561_s1 + $0x274] ss:$28 sps:$4 sm:$0xff]  }
   0xc   :  { %724 = vmatprep.subr.bf16.mxu0 %v5047_v12  ;;  %837 = vmatprep.subr.bf16.mxu1 %v5049_v13  ;;  %v5075_v30 = vld [vmem:[%s7561_s1] ss:$28 sps:$4 sm:$0xff]   ;;  %v5082_v35 = vld [vmem:[%s7561_s1 + $0x2a8] ss:$28 sps:$4 sm:$0xff]   ;;  %v5088_v39 = vld [vmem:[%s7561_s1 + $0x270] ss:$28 sps:$4 sm:$0xff]  }
   0xd   :  { %v5077_v32 = vld [vmem:[%s7561_s1 + $0x2a4] ss:$28 sps:$4 sm:$0xff]   ;;  %v5083_v36 = vld [vmem:[%s7561_s1 + $0x26c] ss:$28 sps:$4 sm:$0xff]   ;;  %v5089_v41 = vld [vmem:[%s7561_s1 + $0x234] ss:$28 sps:$4 sm:$0xff]  }
   0xe   :  { %v5081_v34 = vld [vmem:[%s7561_s1 + $0x2a0] ss:$28 sps:$4 sm:$0xff]   ;;  %v5087_v38 = vld [vmem:[%s7561_s1 + $0x268] ss:$28 sps:$4 sm:$0xff]   ;;  %v5093_v43 = vld [vmem:[%s7561_s1 + $0x230] ss:$28 sps:$4 sm:$0xff]  }
   0xf   :  { %725 = vmatpush1.bf16.msra.mxu0 %v5051_v14  ;;  %838 = vmatpush1.bf16.msra.mxu1 %v5052_v15  ;;  %v5770_v40 = vld [vmem:[%s7562_s0 + $0x4] ss:$8 sps:$4 sm:$0xff]   ;;  %v5091_v42 = vld [vmem:[%s7561_s1 + $0x23c] ss:$28 sps:$4 sm:$0xff]   ;;  %v5818_v54 = vld [vmem:[%s7562_s0] ss:$8 sps:$4 sm:$0xff]  }
  0x10   :  { %726 = vmatprep.subr.bf16.mxu0 %v5053_v16  ;;  %839 = vmatprep.subr.bf16.mxu1 %v5055_v17  ;;  %v5094_v44 = vld [vmem:[%s7561_s1 + $0x238] ss:$28 sps:$4 sm:$0xff]   ;;  %v5097_v46 = vld [vmem:[%s7561_s1 + $0x204] ss:$28 sps:$4 sm:$0xff]   ;;  %v5103_v50 = vld [vmem:[%s7561_s1 + $0x1cc] ss:$28 sps:$4 sm:$0xff]  }
  0x11   :  { %4412 = vmatprep.mubr.msk.bf16.mxu0 %vm693_vm0, %v5770_v40  ;;  %4420 = vmatprep.mubr.msk.bf16.mxu1 %vm693_vm0, %v5770_v40  ;;  %v5095_v45 = vld [vmem:[%s7561_s1 + $0x1fc] ss:$28 sps:$4 sm:$0xff]   ;;  %v5101_v49 = vld [vmem:[%s7561_s1 + $0x1c4] ss:$28 sps:$4 sm:$0xff]   ;;  %v5115_v63 = vld [vmem:[%s7561_s1 + $0x130] ss:$28 sps:$4 sm:$0xff]  }
  0x12   :  { %v5099_v47 = vld [vmem:[%s7561_s1 + $0x1f8] ss:$28 sps:$4 sm:$0xff]   ;;  %v5100_v48 = vld [vmem:[%s7561_s1 + $0x200] ss:$28 sps:$4 sm:$0xff]   ;;  %v5106_v52 = vld [vmem:[%s7561_s1 + $0x1c8] ss:$28 sps:$4 sm:$0xff]  }
  0x13   :  { %727 = vmatpush1.bf16.msra.mxu0 %v5057_v18  ;;  %840 = vmatpush1.bf16.msra.mxu1 %v5058_v19  ;;  %v5105_v51 = vld [vmem:[%s7561_s1 + $0x1c0] ss:$28 sps:$4 sm:$0xff]   ;;  %v5116_v58 = vld [vmem:[%s7561_s1 + $0x198] ss:$28 sps:$4 sm:$0xff]   ;;  %v5111_v60 = vld [vmem:[%s7561_s1 + $0x168] ss:$28 sps:$4 sm:$0xff]  }
  0x14   :  { %728 = vmatprep.subr.bf16.mxu0 %v5059_v20  ;;  %841 = vmatprep.subr.bf16.mxu1 %v5061_v21  ;;  %v5118_v53 = vld [vmem:[%s7561_s1 + $0x19c] ss:$28 sps:$4 sm:$0xff]   ;;  %v5124_v59 = vld [vmem:[%s7561_s1 + $0x164] ss:$28 sps:$4 sm:$0xff]   ;;  %v5128_v1 = vld [vmem:[%s7561_s1 + $0x12c] ss:$28 sps:$4 sm:$0xff]  }
  0x15   :  { %v5110_v55 = vld [vmem:[%s7561_s1 + $0x1a0] ss:$28 sps:$4 sm:$0xff]   ;;  %v5851_v62 = vld [vmem:[%s7562_s0 + $0x10] ss:$8 sps:$4 sm:$0xff]   ;;  %v5859_v0 = vld [vmem:[%s7562_s0 + $0x24] ss:$8 sps:$4 sm:$0xff]  }
  0x16   :  { %v5826_v56 = vld [vmem:[%s7562_s0 + $0x14] ss:$8 sps:$4 sm:$0xff]   ;;  %v5126_v3 = vld [vmem:[%s7561_s1 + $0x128] ss:$28 sps:$4 sm:$0xff]   ;;  %v5133_v8 = vld [vmem:[%s7561_s1 + $0xf0] ss:$28 sps:$4 sm:$0xff]  }
  0x17   :  { %729 = vmatpush1.bf16.msra.mxu0 %v5063_v22  ;;  %842 = vmatpush1.bf16.msra.mxu1 %v5064_v23  ;;  %v5122_v61 = vld [vmem:[%s7561_s1 + $0x160] ss:$28 sps:$4 sm:$0xff]   ;;  %v5125_v2 = vld [vmem:[%s7561_s1 + $0xf8] ss:$28 sps:$4 sm:$0xff]   ;;  %v5136_v10 = vld [vmem:[%s7561_s1 + $0x88] ss:$28 sps:$4 sm:$0xff]  }
  0x18   :  { %730 = vmatprep.subr.bf16.mxu0 %v5065_v24  ;;  %843 = vmatprep.subr.bf16.mxu1 %v5067_v25  ;;  %v5135_v4 = vld [vmem:[%s7561_s1 + $0xf4] ss:$28 sps:$4 sm:$0xff]   ;;  %v5884_v5 = vld [vmem:[%s7562_s0 + $0x20] ss:$8 sps:$4 sm:$0xff]   ;;  %v5139_v9 = vld [vmem:[%s7561_s1 + $0xbc] ss:$28 sps:$4 sm:$0xff]  }
  0x19   :  { %v5129_v6 = vld [vmem:[%s7561_s1 + $0xc0] ss:$28 sps:$4 sm:$0xff]   ;;  %v5137_v11 = vld [vmem:[%s7561_s1 + $0xb8] ss:$28 sps:$4 sm:$0xff]   ;;  %v5925_v14 = vld [vmem:[%s7562_s0 + $0x44] ss:$8 sps:$4 sm:$0xff]  }
  0x1a   :  { %v5892_v7 = vld [vmem:[%s7562_s0 + $0x34] ss:$8 sps:$4 sm:$0xff]   ;;  %v5146_v12 = vld [vmem:[%s7561_s1 + $0x84] ss:$28 sps:$4 sm:$0xff]   ;;  %v5920_v13 = vld [vmem:[%s7562_s0 + $0x30] ss:$8 sps:$4 sm:$0xff]  }
  0x1b   :  { %731 = vmatpush1.bf16.msra.mxu0 %v5069_v26  ;;  %844 = vmatpush1.bf16.msra.mxu1 %v5070_v27  ;;  %v5142_v15 = vld [vmem:[%s7561_s1 + $0x50] ss:$28 sps:$4 sm:$0xff]   ;;  %v5144_v16 = vld [vmem:[%s7561_s1 + $0x80] ss:$28 sps:$4 sm:$0xff]   ;;  %v5147_v18 = vld [vmem:[%s7561_s1 + $0x48] ss:$28 sps:$4 sm:$0xff]  }
  0x1c   :  { %732 = vmatprep.subr.bf16.mxu0 %v5071_v28  ;;  %845 = vmatprep.subr.bf16.mxu1 %v5073_v29  ;;  %v5149_v17 = vld [vmem:[%s7561_s1 + $0x4c] ss:$28 sps:$4 sm:$0xff]   ;;  %v5150_v19 = vld [vmem:[%s7561_s1 + $0x18] ss:$28 sps:$4 sm:$0xff]   ;;  %v5161_v27 = vld [vmem:[%s7561_s1 + $0x280] ss:$28 sps:$4 sm:$0xff]  }
  0x1d   :  { %v5156_v20 = vld [vmem:[%s7561_s1 + $0x14] ss:$28 sps:$4 sm:$0xff]   ;;  %v5956_v21 = vld [vmem:[%s7562_s0 + $0x40] ss:$8 sps:$4 sm:$0xff]   ;;  %v5167_v28 = vld [vmem:[%s7561_s1 + $0x27c] ss:$28 sps:$4 sm:$0xff]  }
  0x1e   :  { %v5961_v22 = vld [vmem:[%s7562_s0 + $0x54] ss:$8 sps:$4 sm:$0xff]   ;;  %v5154_v23 = vld [vmem:[%s7561_s1 + $0x10] ss:$28 sps:$4 sm:$0xff]   ;;  %vm4241_vm3 = vcmask 1041408   ;;  %vm5596_vm4 = vmmov 0  }
  0x1f   :  { %733 = vmatpush1.bf16.msra.mxu0 %v5075_v30  ;;  %846 = vmatpush1.bf16.msra.mxu1 %v5076_v31  ;;  %v5157_v24 = vld [vmem:[%s7561_s1 + $0x2b8] ss:$28 sps:$4 sm:$0xff]   ;;  %v5158_v26 = vld [vmem:[%s7561_s1 + $0x2b0] ss:$28 sps:$4 sm:$0xff]   ;;  %vm4237_vm5 = vcmask 818176   ;;  %vm4286_vm6 = vcmask 23552  }
  0x20   :  { %740 = vmatprep.subr.bf16.mxu0 %v5077_v32  ;;  %853 = vmatprep.subr.bf16.mxu1 %v5079_v33  ;;  %v5160_v25 = vld [vmem:[%s7561_s1 + $0x2b4] ss:$28 sps:$4 sm:$0xff]   ;;  %v5997_v30 = vld [vmem:[%s7562_s0 + $0x64] ss:$8 sps:$4 sm:$0xff]  }
  0x21   :  { %v5992_v29 = vld [vmem:[%s7562_s0 + $0x50] ss:$8 sps:$4 sm:$0xff]   ;;  %v5168_v32 = vld [vmem:[%s7561_s1 + $0x248] ss:$28 sps:$4 sm:$0xff]  }
  0x22   :  { %v5165_v31 = vld [vmem:[%s7561_s1 + $0x278] ss:$28 sps:$4 sm:$0xff]   ;;  %v5171_v33 = vld [vmem:[%s7561_s1 + $0x244] ss:$28 sps:$4 sm:$0xff]  }
  0x23   :  { %741 = vmatpush2.bf16.msra.mxu0 %v5081_v34  ;;  %854 = vmatpush2.bf16.msra.mxu1 %v5082_v35  ;;  %v5169_v34 = vld [vmem:[%s7561_s1 + $0x240] ss:$28 sps:$4 sm:$0xff]   ;;  %v5178_v35 = vld [vmem:[%s7561_s1 + $0x210] ss:$28 sps:$4 sm:$0xff]  }
  0x24   :  { %742 = vmatprep.subr.bf16.mxu0 %v5083_v36  ;;  %855 = vmatprep.subr.bf16.mxu1 %v5085_v37  ;;  %v5177_v36 = vld [vmem:[%s7561_s1 + $0x20c] ss:$28 sps:$4 sm:$0xff]  }
  0x25   :  { %v6028_v37 = vld [vmem:[%s7562_s0 + $0x60] ss:$8 sps:$4 sm:$0xff]  }
  0x27   :  { %743 = vmatpush2.bf16.msra.mxu0 %v5087_v38  ;;  %856 = vmatpush2.bf16.msra.mxu1 %v5088_v39  ;;  %v6033_v38 = vld [vmem:[%s7562_s0 + $0x74] ss:$8 sps:$4 sm:$0xff]   ;;  %v5175_v39 = vld [vmem:[%s7561_s1 + $0x208] ss:$28 sps:$4 sm:$0xff]  }
  0x28   :  { %744 = vmatprep.subr.bf16.mxu0 %v5089_v41  ;;  %857 = vmatprep.subr.bf16.mxu1 %v5091_v42  ;;  %v5182_v41 = vld [vmem:[%s7561_s1 + $0x1d8] ss:$28 sps:$4 sm:$0xff]  }
  0x29   :  { %v5181_v42 = vld [vmem:[%s7561_s1 + $0x1d4] ss:$28 sps:$4 sm:$0xff]  }
  0x2b   :  { %745 = vmatpush2.bf16.msra.mxu0 %v5093_v43  ;;  %858 = vmatpush2.bf16.msra.mxu1 %v5094_v44  ;;  %v5179_v43 = vld [vmem:[%s7561_s1 + $0x1d0] ss:$28 sps:$4 sm:$0xff]  }
  0x2c   :  { %746 = vmatprep.subr.bf16.mxu0 %v5095_v45  ;;  %859 = vmatprep.subr.bf16.mxu1 %v5097_v46  ;;  %v6057_v44 = vld [vmem:[%s7562_s0 + $0x70] ss:$8 sps:$4 sm:$0xff]   ;;  %v5185_v45 = vld [vmem:[%s7563_s3 + $0xe4] ss:$16 sps:$4 sm:$0xff]  }
  0x2d   :  { %v5183_v46 = vld [vmem:[%s7563_s3 + $0xe0] ss:$16 sps:$4 sm:$0xff]  }
  0x2f   :  { %747 = vmatpush2.bf16.msra.mxu0 %v5099_v47  ;;  %860 = vmatpush2.bf16.msra.mxu1 %v5100_v48  ;;  %v5188_v47 = vld [vmem:[%s7563_s3 + $0x2e4] ss:$16 sps:$4 sm:$0xff]  }
  0x30   :  { %748 = vmatprep.subr.bf16.mxu0 %v5101_v49  ;;  %861 = vmatprep.subr.bf16.mxu1 %v5103_v50  ;;  %v5191_v48 = vld [vmem:[%s7563_s3 + $0xc4] ss:$16 sps:$4 sm:$0xff]   ;;  %v5189_v49 = vld [vmem:[%s7563_s3 + $0xc0] ss:$16 sps:$4 sm:$0xff]  }
  0x31   :  { %v5194_v50 = vld [vmem:[%s7563_s3 + $0x2c4] ss:$16 sps:$4 sm:$0xff]  }
  0x33   :  { %749 = vmatpush2.bf16.msra.mxu0 %v5105_v51  ;;  %862 = vmatpush2.bf16.msra.mxu1 %v5106_v52  ;;  %v5192_v51 = vld [vmem:[%s7563_s3 + $0x2c0] ss:$16 sps:$4 sm:$0xff]   ;;  %v5197_v52 = vld [vmem:[%s7563_s3 + $0xa4] ss:$16 sps:$4 sm:$0xff]  }
  0x34   :  { %1057 = vmatprep.subr.bf16.mxu1 %v7571_v57  ;;  %944 = vmatprep.subr.bf16.mxu0 %v5118_v53  ;;  %v5195_v53 = vld [vmem:[%s7563_s3 + $0xa0] ss:$16 sps:$4 sm:$0xff]  }
  0x36   :  { %751 = vmatmul.mubr.bf16.vlgmr.msra.gmra.mxu0 %v5818_v54  ;;  %864 = vmatmul.mubr.bf16.vlgmr.msra.gmra.mxu1 %v5818_v54 }
  0x37   :  { %1058 = vmatpush1.bf16.msra.mxu1 %v5110_v55  ;;  %4413 = vmatprep.mubr.msk.bf16.mxu0 %vm693_vm0, %v5826_v56  ;;  %v5198_v55 = vld [vmem:[%s7563_s3 + $0x2a0] ss:$16 sps:$4 sm:$0xff]  }
  0x38   :  { %1059 = vmatprep.subr.bf16.mxu1 %v7571_v57  ;;  %4421 = vmatprep.mubr.msk.bf16.mxu1 %vm693_vm0, %v5826_v56 }
  0x39   :  { %945 = vmatpush1.bf16.msra.mxu0 %v5116_v58  ;;  %v5201_v58 = vld [vmem:[%s7563_s3 + $0x80] ss:$16 sps:$4 sm:$0xff]  }
  0x3a   :  { %946 = vmatprep.subr.bf16.mxu0 %v5124_v59  ;;  %v5206_v59 = vld [vmem:[%s7563_s3 + $0x284] ss:$16 sps:$4 sm:$0xff]  }
  0x3b   :  { %1060 = vmatpush1.bf16.msra.mxu1 %v5111_v60  ;;  %v5204_v60 = vld [vmem:[%s7563_s3 + $0x280] ss:$16 sps:$4 sm:$0xff]  }
  0x3c   :  { %1061 = vmatprep.subr.bf16.mxu1 %v7571_v57 }
  0x3d   :  { %947 = vmatpush1.bf16.msra.mxu0 %v5122_v61  ;;  %v5209_v61 = vld [vmem:[%s7563_s3 + $0x64] ss:$16 sps:$4 sm:$0xff]  }
  0x3e   :  { %761 = vmatmul.mubr.bf16.gmra.mxu0 %v5851_v62  ;;  %874 = vmatmul.mubr.bf16.gmra.mxu1 %v5851_v62 }
  0x3f   :  { %1062 = vmatpush1.bf16.msra.mxu1 %v5115_v63  ;;  %4414 = vmatprep.mubr.msk.bf16.mxu0 %vm693_vm0, %v5859_v0  ;;  %v5212_v63 = vld [vmem:[%s7563_s3 + $0x264] ss:$16 sps:$4 sm:$0xff]  }
  0x40   :  { %4422 = vmatprep.mubr.msk.bf16.mxu1 %vm693_vm0, %v5859_v0  ;;  %1063 = vmatprep.subr.bf16.mxu1 %v7571_v57 }
  0x41   :  { %948 = vmatprep.subr.bf16.mxu0 %v5128_v1  ;;  %v5215_v1 = vld [vmem:[%s7563_s3 + $0x44] ss:$16 sps:$4 sm:$0xff]  }
  0x42   :  { %949 = vmatpush1.bf16.msra.mxu0 %v5126_v3  ;;  %v5218_v3 = vld [vmem:[%s7563_s3 + $0x244] ss:$16 sps:$4 sm:$0xff]  }
  0x43   :  { %1064 = vmatpush1.bf16.msra.mxu1 %v5125_v2  ;;  %950 = vmatprep.subr.bf16.mxu0 %v5135_v4  ;;  %v5213_v2 = vld [vmem:[%s7563_s3 + $0x40] ss:$16 sps:$4 sm:$0xff]  }
  0x44   :  { %1065 = vmatprep.subr.bf16.mxu1 %v7571_v57  ;;  %v5216_v4 = vld [vmem:[%s7563_s3 + $0x240] ss:$16 sps:$4 sm:$0xff]  }
  0x46   :  { %771 = vmatmul.mubr.bf16.gmra.mxu0 %v5884_v5  ;;  %884 = vmatmul.mubr.bf16.gmra.mxu1 %v5884_v5 }
  0x47   :  { %1066 = vmatpush1.bf16.msra.mxu1 %v5129_v6  ;;  %4415 = vmatprep.mubr.msk.bf16.mxu0 %vm693_vm0, %v5892_v7  ;;  %v5219_v6 = vld [vmem:[%s7563_s3 + $0x20] ss:$16 sps:$4 sm:$0xff]  }
  0x48   :  { %4423 = vmatprep.mubr.msk.bf16.mxu1 %vm693_vm0, %v5892_v7  ;;  %951 = vmatpush1.bf16.msra.mxu0 %v5133_v8  ;;  %v5222_v8 = vld [vmem:[%s7563_s3 + $0x220] ss:$16 sps:$4 sm:$0xff]  }
  0x49   :  { %1067 = vmatprep.subr.bf16.mxu1 %v7571_v57  ;;  %952 = vmatprep.subr.bf16.mxu0 %v5139_v9  ;;  %v5227_v9 = vld [vmem:[%s7563_s3 + $0x4] ss:$16 sps:$4 sm:$0xff]  }
  0x4b   :  { %1068 = vmatpush1.bf16.msra.mxu1 %v5136_v10  ;;  %v5225_v10 = vld [vmem:[%s7563_s3] ss:$16 sps:$4 sm:$0xff]  }
  0x4c   :  { %953 = vmatpush1.bf16.msra.mxu0 %v5137_v11  ;;  %1069 = vmatprep.subr.bf16.mxu1 %v7571_v57  ;;  %v5230_v11 = vld [vmem:[%s7563_s3 + $0x204] ss:$16 sps:$4 sm:$0xff]  }
  0x4d   :  { %954 = vmatprep.subr.bf16.mxu0 %v5146_v12  ;;  %v5228_v12 = vld [vmem:[%s7563_s3 + $0x200] ss:$16 sps:$4 sm:$0xff]  }
  0x4e   :  { %781 = vmatmul.mubr.bf16.gmra.mxu0 %v5920_v13  ;;  %894 = vmatmul.mubr.bf16.gmra.mxu1 %v5920_v13 }
  0x4f   :  { %4416 = vmatprep.mubr.msk.bf16.mxu0 %vm693_vm0, %v5925_v14  ;;  %4424 = vmatprep.mubr.msk.bf16.mxu1 %vm693_vm0, %v5925_v14 }
  0x50   :  { %1070 = vmatpush1.bf16.msra.mxu1 %v5142_v15  ;;  %955 = vmatpush1.bf16.msra.mxu0 %v5144_v16  ;;  %v5236_v15 = vld [vmem:[%s7563_s3 + $0x3e4] ss:$16 sps:$4 sm:$0xff]   ;;  %v5234_v16 = vld [vmem:[%s7563_s3 + $0x3e0] ss:$16 sps:$4 sm:$0xff]  }
  0x51   :  { %1071 = vmatprep.subr.bf16.mxu1 %v7571_v57  ;;  %956 = vmatprep.subr.bf16.mxu0 %v5149_v17  ;;  %v5239_v17 = vld [vmem:[%s7563_s3 + $0x1c4] ss:$16 sps:$4 sm:$0xff]  }
  0x54   :  { %1072 = vmatpush1.bf16.msra.mxu1 %v5150_v19  ;;  %957 = vmatpush1.bf16.msra.mxu0 %v5147_v18  ;;  %v5237_v18 = vld [vmem:[%s7563_s3 + $0x1c0] ss:$16 sps:$4 sm:$0xff]   ;;  %v5242_v19 = vld [vmem:[%s7563_s3 + $0x3c4] ss:$16 sps:$4 sm:$0xff]  }
  0x55   :  { %958 = vmatprep.subr.bf16.mxu0 %v5156_v20  ;;  %1079 = vmatprep.subr.bf16.mxu1 %v7571_v57  ;;  %v5240_v20 = vld [vmem:[%s7563_s3 + $0x3c0] ss:$16 sps:$4 sm:$0xff]  }
  0x56   :  { %791 = vmatmul.mubr.bf16.gmra.mxu0 %v5956_v21  ;;  %904 = vmatmul.mubr.bf16.gmra.mxu1 %v5956_v21 }
  0x57   :  { %4417 = vmatprep.mubr.msk.bf16.mxu0 %vm693_vm0, %v5961_v22  ;;  %4425 = vmatprep.mubr.msk.bf16.mxu1 %vm693_vm0, %v5961_v22 }
  0x58   :  { %959 = vmatpush1.bf16.msra.mxu0 %v5154_v23  ;;  %1080 = vmatpush2.bf16.msra.mxu1 %v5157_v24  ;;  %v5248_v23 = vld [vmem:[%s7563_s3 + $0x3a4] ss:$16 sps:$4 sm:$0xff]   ;;  %v5246_v24 = vld [vmem:[%s7563_s3 + $0x3a0] ss:$16 sps:$4 sm:$0xff]  }
  0x59   :  { %966 = vmatprep.subr.bf16.mxu0 %v5160_v25  ;;  %1081 = vmatprep.subr.bf16.mxu1 %v7571_v57  ;;  %v5251_v25 = vld [vmem:[%s7563_s3 + $0x184] ss:$16 sps:$4 sm:$0xff]  }
  0x5c   :  { %967 = vmatpush2.bf16.msra.mxu0 %v5158_v26  ;;  %1082 = vmatpush2.bf16.msra.mxu1 %v5161_v27  ;;  %v5249_v26 = vld [vmem:[%s7563_s3 + $0x180] ss:$16 sps:$4 sm:$0xff]   ;;  %v5254_v27 = vld [vmem:[%s7563_s3 + $0x384] ss:$16 sps:$4 sm:$0xff]  }
  0x5d   :  { %968 = vmatprep.subr.bf16.mxu0 %v5167_v28  ;;  %1083 = vmatprep.subr.bf16.mxu1 %v7571_v57  ;;  %v5252_v28 = vld [vmem:[%s7563_s3 + $0x380] ss:$16 sps:$4 sm:$0xff]  }
  0x5e   :  { %801 = vmatmul.mubr.bf16.gmra.mxu0 %v5992_v29  ;;  %914 = vmatmul.mubr.bf16.gmra.mxu1 %v5992_v29 }
  0x5f   :  { %4418 = vmatprep.mubr.msk.bf16.mxu0 %vm693_vm0, %v5997_v30  ;;  %4426 = vmatprep.mubr.msk.bf16.mxu1 %vm693_vm0, %v5997_v30 }
  0x60   :  { %969 = vmatpush2.bf16.msra.mxu0 %v5165_v31  ;;  %1084 = vmatpush2.bf16.msra.mxu1 %v5168_v32  ;;  %v5260_v31 = vld [vmem:[%s7563_s3 + $0x364] ss:$16 sps:$4 sm:$0xff]   ;;  %v5258_v32 = vld [vmem:[%s7563_s3 + $0x360] ss:$16 sps:$4 sm:$0xff]  }
  0x61   :  { %970 = vmatprep.subr.bf16.mxu0 %v5171_v33  ;;  %1085 = vmatprep.subr.bf16.mxu1 %v7571_v57  ;;  %v5263_v33 = vld [vmem:[%s7563_s3 + $0x144] ss:$16 sps:$4 sm:$0xff]  }
  0x64   :  { %971 = vmatpush2.bf16.msra.mxu0 %v5169_v34  ;;  %1086 = vmatpush2.bf16.msra.mxu1 %v5178_v35  ;;  %v5261_v34 = vld [vmem:[%s7563_s3 + $0x140] ss:$16 sps:$4 sm:$0xff]   ;;  %v5266_v35 = vld [vmem:[%s7563_s3 + $0x344] ss:$16 sps:$4 sm:$0xff]  }
  0x65   :  { %972 = vmatprep.subr.bf16.mxu0 %v5177_v36  ;;  %1087 = vmatprep.subr.bf16.mxu1 %v7571_v57  ;;  %v5264_v36 = vld [vmem:[%s7563_s3 + $0x340] ss:$16 sps:$4 sm:$0xff]  }
  0x66   :  { %811 = vmatmul.mubr.bf16.gmra.mxu0 %v6028_v37  ;;  %924 = vmatmul.mubr.bf16.gmra.mxu1 %v6028_v37 }
  0x67   :  { %4419 = vmatprep.mubr.msk.bf16.mxu0 %vm693_vm0, %v6033_v38  ;;  %4427 = vmatprep.mubr.msk.bf16.mxu1 %vm693_vm0, %v6033_v38 }
  0x68   :  { %973 = vmatpush2.bf16.msra.mxu0 %v5175_v39  ;;  %1088 = vmatpush2.bf16.msra.mxu1 %v5182_v41  ;;  %v5272_v39 = vld [vmem:[%s7563_s3 + $0x324] ss:$16 sps:$4 sm:$0xff]   ;;  %v5270_v41 = vld [vmem:[%s7563_s3 + $0x320] ss:$16 sps:$4 sm:$0xff]  }
  0x69   :  { %974 = vmatprep.subr.bf16.mxu0 %v5181_v42  ;;  %2627 = vmatprep.subr.bf16.mxu1 %v5188_v47  ;;  %v5275_v42 = vld [vmem:[%s7563_s3 + $0x104] ss:$16 sps:$4 sm:$0xff]  }
  0x6c   :  { %975 = vmatpush2.bf16.msra.mxu0 %v5179_v43  ;;  %v5273_v43 = vld [vmem:[%s7563_s3 + $0x100] ss:$16 sps:$4 sm:$0xff]  }
  0x6d   :  { %2574 = vmatprep.subr.bf16.mxu0 %v5185_v45  ;;  %v5276_v45 = vld [vmem:[%s7563_s3 + $0x300] ss:$16 sps:$4 sm:$0xff]  }
  0x6e   :  { %821 = vmatmul.mubr.bf16.gmra.mxu0 %v6057_v44  ;;  %934 = vmatmul.mubr.bf16.gmra.mxu1 %v6057_v44 }
  0x6f   :  { %4428 = vmatprep.mubr.msk.bf16.mxu0 %vm693_vm0, %v5770_v40  ;;  %4436 = vmatprep.mubr.msk.bf16.mxu1 %vm693_vm0, %v5770_v40  ;;  %v5186_v40 = vld [vmem:[%s7563_s3 + $0x2e0] ss:$16 sps:$4 sm:$0xff]  }
  0x76   :  { %977 = vmatmul.mubr.bf16.vlgmr.msra.gmra.mxu0 %v5818_v54  ;;  %1090 = vmatmul.mubr.bf16.vlgmr.msra.gmra.mxu1 %v5818_v54  ;;  %v5200_v54 = vld [vmem:[%s7563_s3 + $0x2a4] ss:$16 sps:$4 sm:$0xff]  }
  0x77   :  { %4429 = vmatprep.mubr.msk.bf16.mxu0 %vm693_vm0, %v5826_v56  ;;  %4437 = vmatprep.mubr.msk.bf16.mxu1 %vm693_vm0, %v5826_v56  ;;  %v5203_v56 = vld [vmem:[%s7563_s3 + $0x84] ss:$16 sps:$4 sm:$0xff]  }
  0x78   :  { %2575 = vmatpush1.bf16.msra.mxu0 %v5183_v46  ;;  %2628 = vmatpush1.bf16.msra.mxu1 %v5186_v40  ;;  %v5281_v46 = vld [vmem:[%s7563_s3 + $0x4e4] ss:$16 sps:$4 sm:$0xff]  }
  0x79   :  { %2576 = vmatprep.subr.bf16.mxu0 %v5191_v48  ;;  %2629 = vmatprep.subr.bf16.mxu1 %v5194_v50  ;;  %v5317_v40 = vld [vmem:[%s7563_s3 + $0x624] ss:$16 sps:$4 sm:$0xff]  }
  0x7c   :  { %2577 = vmatpush1.bf16.msra.mxu0 %v5189_v49  ;;  %2630 = vmatpush1.bf16.msra.mxu1 %v5192_v51 }
  0x7d   :  { %2578 = vmatprep.subr.bf16.mxu0 %v5197_v52  ;;  %2631 = vmatprep.subr.bf16.mxu1 %v5200_v54 }
  0x7e   :  { %987 = vmatmul.mubr.bf16.gmra.mxu0 %v5851_v62  ;;  %1098 = vmatmul.mubr.bf16.gmra.mxu1 %v5851_v62  ;;  %v5207_v62 = vld [vmem:[%s7563_s3 + $0x60] ss:$16 sps:$4 sm:$0xff]  }
  0x7f   :  { %4430 = vmatprep.mubr.msk.bf16.mxu0 %vm693_vm0, %v5859_v0  ;;  %4438 = vmatprep.mubr.msk.bf16.mxu1 %vm693_vm0, %v5859_v0  ;;  %v5210_v0 = vld [vmem:[%s7563_s3 + $0x260] ss:$16 sps:$4 sm:$0xff]  }
  0x80   :  { %2579 = vmatpush1.bf16.msra.mxu0 %v5195_v53  ;;  %2632 = vmatpush1.bf16.msra.mxu1 %v5198_v55 }
  0x81   :  { %2580 = vmatprep.subr.bf16.mxu0 %v5203_v56  ;;  %2633 = vmatprep.subr.bf16.mxu1 %v5206_v59 }
  0x84   :  { %2581 = vmatpush1.bf16.msra.mxu0 %v5201_v58  ;;  %2634 = vmatpush1.bf16.msra.mxu1 %v5204_v60 }
  0x85   :  { %2582 = vmatprep.subr.bf16.mxu0 %v5209_v61  ;;  %2635 = vmatprep.subr.bf16.mxu1 %v5212_v63 }
  0x86   :  { %997 = vmatmul.mubr.bf16.gmra.mxu0 %v5884_v5  ;;  %1106 = vmatmul.mubr.bf16.gmra.mxu1 %v5884_v5  ;;  %v5221_v5 = vld [vmem:[%s7563_s3 + $0x24] ss:$16 sps:$4 sm:$0xff]  }
  0x87   :  { %4431 = vmatprep.mubr.msk.bf16.mxu0 %vm693_vm0, %v5892_v7  ;;  %4439 = vmatprep.mubr.msk.bf16.mxu1 %vm693_vm0, %v5892_v7  ;;  %v5224_v7 = vld [vmem:[%s7563_s3 + $0x224] ss:$16 sps:$4 sm:$0xff]  }
  0x88   :  { %2583 = vmatpush1.bf16.msra.mxu0 %v5207_v62  ;;  %2636 = vmatpush1.bf16.msra.mxu1 %v5210_v0 }
  0x89   :  { %2584 = vmatprep.subr.bf16.mxu0 %v5215_v1  ;;  %2637 = vmatprep.subr.bf16.mxu1 %v5218_v3 }
  0x8c   :  { %2585 = vmatpush1.bf16.msra.mxu0 %v5213_v2  ;;  %2638 = vmatpush1.bf16.msra.mxu1 %v5216_v4 }
  0x8d   :  { %2586 = vmatprep.subr.bf16.mxu0 %v5221_v5  ;;  %2639 = vmatprep.subr.bf16.mxu1 %v5224_v7 }
  0x8e   :  { %1007 = vmatmul.mubr.bf16.gmra.mxu0 %v5920_v13  ;;  %1114 = vmatmul.mubr.bf16.gmra.mxu1 %v5920_v13  ;;  %v5233_v13 = vld [vmem:[%s7563_s3 + $0x1e4] ss:$16 sps:$4 sm:$0xff]  }
  0x8f   :  { %4432 = vmatprep.mubr.msk.bf16.mxu0 %vm693_vm0, %v5925_v14  ;;  %4440 = vmatprep.mubr.msk.bf16.mxu1 %vm693_vm0, %v5925_v14  ;;  %v5231_v14 = vld [vmem:[%s7563_s3 + $0x1e0] ss:$16 sps:$4 sm:$0xff]  }
  0x90   :  { %2587 = vmatpush1.bf16.msra.mxu0 %v5219_v6  ;;  %2640 = vmatpush1.bf16.msra.mxu1 %v5222_v8 }
  0x91   :  { %2588 = vmatprep.subr.bf16.mxu0 %v5227_v9  ;;  %2641 = vmatprep.subr.bf16.mxu1 %v5230_v11 }
  0x94   :  { %2589 = vmatpush1.bf16.msra.mxu0 %v5225_v10  ;;  %2642 = vmatpush1.bf16.msra.mxu1 %v5228_v12 }
  0x95   :  { %2590 = vmatprep.subr.bf16.mxu0 %v5233_v13  ;;  %2643 = vmatprep.subr.bf16.mxu1 %v5236_v15 }
  0x96   :  { %1017 = vmatmul.mubr.bf16.gmra.mxu0 %v5956_v21  ;;  %1122 = vmatmul.mubr.bf16.gmra.mxu1 %v5956_v21  ;;  %v5245_v21 = vld [vmem:[%s7563_s3 + $0x1a4] ss:$16 sps:$4 sm:$0xff]  }
  0x97   :  { %4433 = vmatprep.mubr.msk.bf16.mxu0 %vm693_vm0, %v5961_v22  ;;  %4441 = vmatprep.mubr.msk.bf16.mxu1 %vm693_vm0, %v5961_v22  ;;  %v5243_v22 = vld [vmem:[%s7563_s3 + $0x1a0] ss:$16 sps:$4 sm:$0xff]  }
  0x98   :  { %2591 = vmatpush2.bf16.msra.mxu0 %v5231_v14  ;;  %2644 = vmatpush2.bf16.msra.mxu1 %v5234_v16 }
  0x99   :  { %2592 = vmatprep.subr.bf16.mxu0 %v5239_v17  ;;  %2645 = vmatprep.subr.bf16.mxu1 %v5242_v19 }
  0x9c   :  { %2593 = vmatpush2.bf16.msra.mxu0 %v5237_v18  ;;  %2646 = vmatpush2.bf16.msra.mxu1 %v5240_v20 }
  0x9d   :  { %2594 = vmatprep.subr.bf16.mxu0 %v5245_v21  ;;  %2647 = vmatprep.subr.bf16.mxu1 %v5248_v23 }
  0x9e   :  { %1027 = vmatmul.mubr.bf16.gmra.mxu0 %v5992_v29  ;;  %1130 = vmatmul.mubr.bf16.gmra.mxu1 %v5992_v29  ;;  %v5257_v29 = vld [vmem:[%s7563_s3 + $0x164] ss:$16 sps:$4 sm:$0xff]  }
  0x9f   :  { %4434 = vmatprep.mubr.msk.bf16.mxu0 %vm693_vm0, %v5997_v30  ;;  %4442 = vmatprep.mubr.msk.bf16.mxu1 %vm693_vm0, %v5997_v30  ;;  %v5255_v30 = vld [vmem:[%s7563_s3 + $0x160] ss:$16 sps:$4 sm:$0xff]  }
  0xa0   :  { %2595 = vmatpush2.bf16.msra.mxu0 %v5243_v22  ;;  %2648 = vmatpush2.bf16.msra.mxu1 %v5246_v24  ;;  %v1240_v22 = vlaneseq }
  0xa1   :  { %2596 = vmatprep.subr.bf16.mxu0 %v5251_v25  ;;  %2649 = vmatprep.subr.bf16.mxu1 %v5254_v27 }
  0xa2   :  { %v6379_v27 = vshrl.u32 %v1240_v22, 7 }
  0xa4   :  { %2597 = vmatpush2.bf16.msra.mxu0 %v5249_v26  ;;  %2650 = vmatpush2.bf16.msra.mxu1 %v5252_v28 }
  0xa5   :  { %2598 = vmatprep.subr.bf16.mxu0 %v5257_v29  ;;  %2651 = vmatprep.subr.bf16.mxu1 %v5260_v31 }
  0xa6   :  { %1037 = vmatmul.mubr.bf16.gmra.mxu0 %v6028_v37  ;;  %1138 = vmatmul.mubr.bf16.gmra.mxu1 %v6028_v37  ;;  %v5269_v37 = vld [vmem:[%s7563_s3 + $0x124] ss:$16 sps:$4 sm:$0xff]  }
  0xa7   :  { %4435 = vmatprep.mubr.msk.bf16.mxu0 %vm693_vm0, %v6033_v38  ;;  %4443 = vmatprep.mubr.msk.bf16.mxu1 %vm693_vm0, %v6033_v38  ;;  %v5267_v38 = vld [vmem:[%s7563_s3 + $0x120] ss:$16 sps:$4 sm:$0xff]  }
  0xa8   :  { %2599 = vmatpush2.bf16.msra.mxu0 %v5255_v30  ;;  %2652 = vmatpush2.bf16.msra.mxu1 %v5258_v32  ;;  %v7573_v32 = vsub.s32 0, %v6379_v27 }
  0xa9   :  { %2600 = vmatprep.subr.bf16.mxu0 %v5263_v33  ;;  %2653 = vmatprep.subr.bf16.mxu1 %v5266_v35  ;;  %v6393_v33 = vld [vmem:[%s7564_s2] sm:$0x7f] }
  0xac   :  { %2601 = vmatpush2.bf16.msra.mxu0 %v5261_v34  ;;  %2654 = vmatpush2.bf16.msra.mxu1 %v5264_v36  ;;  %v7575_v34 = vsub.s32 2, %v6379_v27 }
  0xad   :  { %2602 = vmatprep.subr.bf16.mxu0 %v5269_v37  ;;  %2655 = vmatprep.subr.bf16.mxu1 %v5272_v39  ;;  %v7576_v37 = vsub.s32 1, %v6379_v27 }
  0xae   :  { %1047 = vmatmul.mubr.bf16.gmra.mxu0 %v6057_v44  ;;  %1146 = vmatmul.mubr.bf16.gmra.mxu1 %v6057_v44  ;;  %v5278_v44 = vld [vmem:[%s7563_s3 + $0x304] ss:$16 sps:$4 sm:$0xff]  }
  0xb0   :  { %2603 = vmatpush2.bf16.msra.mxu0 %v5267_v38  ;;  %2656 = vmatpush2.bf16.msra.mxu1 %v5270_v41  ;;  %v7574_v38 = vsub.s32 3, %v6379_v27  ;;  %v6405_v41 = vrot.slane %v6393_v33, %v7573_v32  ;;  %v6421_v32 = vrot.slane %v6393_v33, %v7576_v37 }
  0xb1   :  { %2604 = vmatprep.subr.bf16.mxu0 %v5275_v42  ;;  %2657 = vmatprep.subr.bf16.mxu1 %v5278_v44 }
  0xb4   :  { %2605 = vmatpush2.bf16.msra.mxu0 %v5273_v43  ;;  %2658 = vmatpush2.bf16.msra.mxu1 %v5276_v45 }
  0xb5   :  { %2680 = vmatprep.subr.bf16.mxu0 %v5281_v46  ;;  %2745 = vmatprep.subr.bf16.mxu1 %v5317_v40  ;;  %v6412_v46 = vrot.slane %v6393_v33, %v7575_v34 }
  0xf6   :  { %v6307_v47 = vpop.f32.mrf.mxu0  ;;  %v6309_v48 = vpop.f32.mrf.mxu1 }
  0xf8   :  { %v6311_v49 = vpop.f32.mrf.mxu0  ;;  %v6313_v50 = vpop.f32.mrf.mxu1 }
  0xfa   :  { %v6315_v51 = vpop.f32.mrf.mxu0  ;;  %v6317_v52 = vpop.f32.mrf.mxu1 }
  0xfc   :  { %v6319_v53 = vpop.f32.mrf.mxu0  ;;  %v6321_v54 = vpop.f32.mrf.mxu1 }
  0xfe   :  { %v6323_v55 = vpop.f32.mrf.mxu0  ;;  %v6325_v56 = vpop.f32.mrf.mxu1 }
 0x100   :  { %v6327_v58 = vpop.f32.mrf.mxu0  ;;  %v6329_v59 = vpop.f32.mrf.mxu1 }
 0x102   :  { %v6331_v60 = vpop.f32.mrf.mxu0  ;;  %v6333_v61 = vpop.f32.mrf.mxu1 }
 0x104   :  { %v6335_v62 = vpop.f32.mrf.mxu0  ;;  %v6337_v63 = vpop.f32.mrf.mxu1 }
 0x106   :  { %v6339_v0 = vpop.f32.mrf.mxu0  ;;  %v6341_v1 = vpop.f32.mrf.mxu1 }
 0x107   :  { %v1154_v43 = vmax.f32 %v6307_v47, %v6339_v0  ;;  %v1156_v40 = vmax.f32 %v6309_v48, %v6341_v1  ;;  %v6426_v0 = vrot.slane %v6393_v33, %v7574_v38 }
 0x108   :  { %v6343_v2 = vpop.f32.mrf.mxu0  ;;  %v6345_v3 = vpop.f32.mrf.mxu1 }
 0x109   :  { %v1155_v22 = vmax.f32 %v6311_v49, %v6343_v2 }
 0x10a   :  { %v6347_v4 = vpop.f32.mrf.mxu0  ;;  %v6349_v5 = vpop.f32.mrf.mxu1 }
 0x10b   :  { %v1161_v48 = vmax.f32 %v6315_v51, %v6347_v4  ;;  %v1163_v2 = vmax.f32 %v6317_v52, %v6349_v5 }
 0x10c   :  { %v6351_v6 = vpop.f32.mrf.mxu0  ;;  %v6353_v7 = vpop.f32.mrf.mxu1 }
 0x10e   :  { %v6355_v8 = vpop.f32.mrf.mxu0  ;;  %v6357_v9 = vpop.f32.mrf.mxu1 }
 0x110   :  { %v6359_v10 = vpop.f32.mrf.mxu0  ;;  %v6361_v11 = vpop.f32.mrf.mxu1 }
 0x111   :  { %v1169_v52 = vmax.f32 %v6327_v58, %v6359_v10 }
 0x112   :  { %v6363_v12 = vpop.f32.mrf.mxu0  ;;  %v6365_v13 = vpop.f32.mrf.mxu1 }
 0x114   :  { %v6367_v14 = vpop.f32.mrf.mxu0  ;;  %v6369_v15 = vpop.f32.mrf.mxu1 }
 0x116   :  { %v792_v16 = vpop.f32.mrf.mxu0  ;;  %v905_v17 = vpop.f32.mrf.mxu1 }
 0x118   :  { %v794_v18 = vpop.f32.mrf.mxu0  ;;  %v907_v19 = vpop.f32.mrf.mxu1 }
 0x11a   :  { %v796_v20 = vpop.f32.mrf.mxu0  ;;  %v909_v21 = vpop.f32.mrf.mxu1 }
 0x11c   :  { %v6371_v23 = vpop.f32.mrf.mxu0  ;;  %v6373_v24 = vpop.f32.mrf.mxu1 }
 0x11e   :  { %v6375_v25 = vpop.f32.mrf.mxu0  ;;  %v6377_v26 = vpop.f32.mrf.mxu1 }
 0x120   :  { %v6381_v28 = vpop.f32.mrf.mxu0  ;;  %v6383_v29 = vpop.f32.mrf.mxu1 }
 0x122   :  { %v6385_v30 = vpop.f32.mrf.mxu0  ;;  %v6387_v31 = vpop.f32.mrf.mxu1 }
 0x124   :  { %v6396_v35 = vpop.f32.mrf.mxu0  ;;  %v6398_v36 = vpop.f32.mrf.mxu1 }
 0x126   :  { %v812_v39 = vpop.f32.mrf.mxu0  ;;  %v925_v42 = vpop.f32.mrf.mxu1 }
 0x127   :  { %v1182_v44 = vmax.f32 %v792_v16, %v812_v39  ;;  %v1184_v45 = vmax.f32 %v905_v17, %v925_v42  ;;  %v1157_v16 = vmax.f32 %v6313_v50, %v6345_v3  ;;  %v1162_v17 = vmax.f32 %v6319_v53, %v6351_v6 }
 0x128   :  { %v814_v57 = vpop.f32.mrf.mxu0  ;;  %v927_v47 = vpop.f32.mrf.mxu1  ;;  %v1164_v39 = vmax.f32 %v6321_v54, %v6353_v7  ;;  %v1168_v42 = vmax.f32 %v6323_v55, %v6355_v8  ;;  %v1171_v54 = vmax.f32 %v6329_v59, %v6361_v11  ;;  %v1175_v55 = vmax.f32 %v6331_v60, %v6363_v12 }
 0x129   :  { %v1183_v1 = vmax.f32 %v794_v18, %v814_v57  ;;  %v1185_v49 = vmax.f32 %v907_v19, %v927_v47  ;;  %v1210_v50 = vmax.f32 %v1154_v43, %v1182_v44  ;;  %v1212_v3 = vmax.f32 %v1156_v40, %v1184_v45 }
 0x12a   :  { %v816_v38 = vpop.f32.mrf.mxu0  ;;  %v929_v34 = vpop.f32.mrf.mxu1  ;;  %v1170_v57 = vmax.f32 %v6325_v56, %v6357_v9  ;;  %v1177_v7 = vmax.f32 %v6333_v61, %v6365_v13  ;;  %v1176_v8 = vmax.f32 %v6335_v62, %v6367_v14 }
 0x12b   :  { %v1211_v37 = vmax.f32 %v1155_v22, %v1183_v1  ;;  %v1213_v51 = vmax.f32 %v1157_v16, %v1185_v49  ;;  %v1189_v4 = vmax.f32 %v796_v20, %v816_v38  ;;  %v1191_v53 = vmax.f32 %v909_v21, %v929_v34 }
 0x12c   :  { %v818_v5 = vpop.f32.mrf.mxu0  ;;  %v931_v6 = vpop.f32.mrf.mxu1  ;;  %v1275_v20 = vadd.f32 %v6405_v41, %v1210_v50  ;;  %v1277_v59 = vadd.f32 %v6412_v46, %v1212_v3 }
 0x12d   :  { %v1217_v56 = vmax.f32 %v1161_v48, %v1189_v4  ;;  %v1219_v9 = vmax.f32 %v1163_v2, %v1191_v53  ;;  %v1190_v58 = vmax.f32 %v6371_v23, %v818_v5  ;;  %v1192_v10 = vmax.f32 %v6373_v24, %v931_v6 }
 0x12e   :  { %v822_v18 = vpop.f32.mrf.mxu0  ;;  %v935_v19 = vpop.f32.mrf.mxu1  ;;  %v1276_v60 = vadd.f32 %v6421_v32, %v1211_v37  ;;  %v1278_v11 = vadd.f32 %v6426_v0, %v1213_v51  ;;  %v1178_v37 = vmax.f32 %v6337_v63, %v6369_v15  ;;  %v1303_v22 = vmax.f32 %v1275_v20, 0.0 }
 0x12f   :  { %v1282_v61 = vadd.f32 %v6405_v41, %v1217_v56  ;;  %v1218_v12 = vmax.f32 %v1162_v17, %v1190_v58  ;;  %v1220_v62 = vmax.f32 %v1164_v39, %v1192_v10  ;;  %v1196_v13 = vmax.f32 %v6375_v25, %v822_v18  ;;  %v5284_v58 = vld [vmem:[%s7563_s3 + $0x4c4] ss:$16 sps:$4 sm:$0xff]   ;;  %v5315_v10 = vld [vmem:[%s7563_s3 + $0x620] ss:$16 sps:$4 sm:$0xff]  }
 0x130   :  { %v824_v14 = vpop.f32.mrf.mxu0  ;;  %v937_v21 = vpop.f32.mrf.mxu1  ;;  %v1284_v23 = vadd.f32 %v6412_v46, %v1219_v9  ;;  %v1198_v24 = vmax.f32 %v6377_v26, %v935_v19  ;;  %v1305_v47 = vmax.f32 %v1277_v59, 0.0  ;;  %v1304_v1 = vmax.f32 %v1276_v60, 0.0 }
 0x131   :  { %v1197_v34 = vmax.f32 %v6381_v28, %v824_v14  ;;  %v1199_v38 = vmax.f32 %v6383_v29, %v937_v21  ;;  %v1310_v43 = vmax.f32 %v1282_v61, 0.0  ;;  %v1283_v44 = vadd.f32 %v6421_v32, %v1218_v12 }
 0x132   :  { %v1285_v45 = vadd.f32 %v6426_v0, %v1220_v62  ;;  %v826_v40 = vpop.f32.mrf.mxu0  ;;  %v939_v25 = vpop.f32.mrf.mxu1  ;;  %v1306_v26 = vmax.f32 %v1278_v11, 0.0  ;;  %v1312_v63 = vmax.f32 %v1284_v23, 0.0  ;;  %v1224_v15 = vmax.f32 %v1168_v42, %v1196_v13 }
 0x133   :  { %v1225_v16 = vmax.f32 %v1169_v52, %v1197_v34  ;;  %v1227_v48 = vmax.f32 %v1171_v54, %v1199_v38  ;;  %v1311_v49 = vmax.f32 %v1283_v44, 0.0  ;;  %v6468_v17 = vpack.c.bf16 %v1310_v43, %v1303_v22 }
 0x134   :  { %v1313_v28 = vmax.f32 %v1285_v45, 0.0  ;;  %v828_v2 = vpop.f32.mrf.mxu0  ;;  %v941_v29 = vpop.f32.mrf.mxu1  ;;  %v1226_v39 = vmax.f32 %v1170_v57, %v1198_v24  ;;  %v1203_v50 = vmax.f32 %v6385_v30, %v826_v40  ;;  %v1205_v3 = vmax.f32 %v6387_v31, %v939_v25  ;;  %v5279_v30 = vld [vmem:[%s7563_s3 + $0x4e0] ss:$16 sps:$4 sm:$0xff]   ;;  %v5335_v45 = vld [vmem:[%s7563_s3 + $0xec] ss:$16 sps:$4 sm:$0xff]  }
 0x135   :  { %v1204_v51 = vmax.f32 %v6396_v35, %v828_v2  ;;  %v1206_v52 = vmax.f32 %v6398_v36, %v941_v29  ;;  %v1290_v5 = vadd.f32 %v6421_v32, %v1225_v16  ;;  %v1292_v6 = vadd.f32 %v6426_v0, %v1227_v48  ;;  %v5324_v24 = vld [vmem:[%s7563_s3 + $0x600] ss:$16 sps:$4 sm:$0xff]   ;;  %v5290_v48 = vld [vmem:[%s7563_s3 + $0x484] ss:$16 sps:$4 sm:$0xff]  }
 0x136   :  { %v6474_v4 = vpop.f32.mrf.mxu0  ;;  %v6476_v53 = vpop.f32.mrf.mxu1  ;;  %v6480_v54 = vpack.c.bf16 %v1311_v49, %v1304_v1  ;;  %v6482_v42 = vpack.c.bf16 %v1313_v28, %v1306_v26  ;;  %v1231_v31 = vmax.f32 %v1175_v55, %v1203_v50  ;;  %v1233_v35 = vmax.f32 %v1177_v7, %v1205_v3  ;;  %v5326_v55 = vld [vmem:[%s7563_s3 + $0x604] ss:$16 sps:$4 sm:$0xff]   ;;  %v5285_v25 = vld [vmem:[%s7563_s3 + $0x4a0] ss:$16 sps:$4 sm:$0xff]  }
 0x137   :  { %v1232_v57 = vmax.f32 %v1176_v8, %v1204_v51  ;;  %v1234_v36 = vmax.f32 %v1178_v37, %v1206_v52  ;;  %v6495_v18 = vpack.c.bf16 %v1312_v63, %v1305_v47  ;;  %v1289_v19 = vadd.f32 %v6405_v41, %v1224_v15  ;;  %v5288_v28 = vld [vmem:[%s7563_s3 + $0x480] ss:$16 sps:$4 sm:$0xff]   ;;  %v5293_v63 = vld [vmem:[%s7563_s3 + $0x464] ss:$16 sps:$4 sm:$0xff]  }
 0x138   :  { %v6487_v56 = vpop.f32.mrf.mxu0  ;;  %v1093_v9 = vpop.f32.mrf.mxu1  ;;  %2606 = vmatprep.mubr.bf16.mxu0 %v6480_v54  ;;  %2659 = vmatprep.mubr.bf16.mxu1 %v6482_v42  ;;  %v1296_v7 = vadd.f32 %v6405_v41, %v1231_v31  ;;  %v1298_v8 = vadd.f32 %v6412_v46, %v1233_v35  ;;  %v1291_v61 = vadd.f32 %v6412_v46, %v1226_v39  ;;  %v1318_v12 = vmax.f32 %v1290_v5, 0.0  ;;  %v5282_v41 = vld [vmem:[%s7563_s3 + $0x4c0] ss:$16 sps:$4 sm:$0xff]   ;;  %v5287_v46 = vld [vmem:[%s7563_s3 + $0x4a4] ss:$16 sps:$4 sm:$0xff]  }
 0x139   :  { %v1297_v20 = vadd.f32 %v6421_v32, %v1232_v57  ;;  %v1299_v59 = vadd.f32 %v6426_v0, %v1234_v36  ;;  %2607 = vmatmul.mubr.bf16.vlgmr.msra.gmra.mxu0 %v6468_v17  ;;  %2660 = vmatmul.mubr.bf16.vlgmr.msra.gmra.mxu1 %v6495_v18  ;;  %v1320_v62 = vmax.f32 %v1292_v6, 0.0  ;;  %v1317_v34 = vmax.f32 %v1289_v19, 0.0  ;;  %v5291_v3 = vld [vmem:[%s7563_s3 + $0x460] ss:$16 sps:$4 sm:$0xff]   ;;  %v5296_v5 = vld [vmem:[%s7563_s3 + $0x444] ss:$16 sps:$4 sm:$0xff]  }
 0x13a   :  { %v6508_v60 = vpop.f32.mrf.mxu0  ;;  %v6510_v11 = vpop.f32.mrf.mxu1  ;;  %2681 = vmatpush1.bf16.msra.mxu0 %v5279_v30  ;;  %v1324_v32 = vmax.f32 %v1296_v7, 0.0  ;;  %2746 = vmatpush1.bf16.msra.mxu1 %v5315_v10  ;;  %v1326_v23 = vmax.f32 %v1298_v8, 0.0  ;;  %v1319_v40 = vmax.f32 %v1291_v61, 0.0  ;;  %v7577_v15 = vmov 0   ;;  %v5294_v31 = vld [vmem:[%s7563_s3 + $0x440] ss:$16 sps:$4 sm:$0xff]  }
 0x13b   :  { %v1325_v13 = vmax.f32 %v1297_v20, 0.0  ;;  %v1327_v0 = vmax.f32 %v1299_v59, 0.0  ;;  %2682 = vmatprep.subr.bf16.mxu0 %v5284_v58  ;;  %2747 = vmatprep.subr.bf16.mxu1 %v5326_v55  ;;  %v5299_v36 = vld [vmem:[%s7563_s3 + $0x424] ss:$16 sps:$4 sm:$0xff]   ;;  %v5297_v10 = vld [vmem:[%s7563_s3 + $0x420] ss:$16 sps:$4 sm:$0xff]  }
 0x13c   :  { %v6517_v14 = vpop.f32.mrf.mxu0  ;;  %v1096_v21 = vpop.f32.mrf.mxu1  ;;  %v6543_v16 = vpack.c.bf16 %v1324_v32, %v1317_v34  ;;  %v6548_v1 = vpack.c.bf16 %v1326_v23, %v1319_v40  ;;  %v5302_v7 = vld [vmem:[%s7563_s3 + $0x404] ss:$16 sps:$4 sm:$0xff]   ;;  %v5300_v59 = vld [vmem:[%s7563_s3 + $0x400] ss:$16 sps:$4 sm:$0xff]  }
 0x13d   :  { %v6529_v43 = vpack.c.bf16 %v1325_v13, %v1318_v12  ;;  %v6531_v44 = vpack.c.bf16 %v1327_v0, %v1320_v62  ;;  %v5303_v13 = vld [vmem:[%s7563_s3 + $0x5e0] ss:$16 sps:$4 sm:$0xff]   ;;  %v5308_v23 = vld [vmem:[%s7563_s3 + $0x5c4] ss:$16 sps:$4 sm:$0xff]  }
 0x13e   :  { %v6525_v38 = vpop.f32.mrf.mxu0  ;;  %v6527_v37 = vpop.f32.mrf.mxu1  ;;  %2683 = vmatpush1.bf16.msra.mxu0 %v5282_v41  ;;  %2748 = vmatpush1.bf16.msra.mxu1 %v5324_v24  ;;  %v5305_v41 = vld [vmem:[%s7563_s3 + $0x5e4] ss:$16 sps:$4 sm:$0xff]   ;;  %v5306_v34 = vld [vmem:[%s7563_s3 + $0x5c0] ss:$16 sps:$4 sm:$0xff]  }
 0x13f   :  { %2616 = vmatprep.mubr.bf16.mxu0 %v6529_v43  ;;  %2669 = vmatprep.mubr.bf16.mxu1 %v6531_v44 }
 0x140   :  { %v6541_v22 = vpop.f32.mrf.mxu0  ;;  %v1101_v47 = vpop.f32.mrf.mxu1  ;;  %2684 = vmatprep.subr.bf16.mxu0 %v5287_v46  ;;  %2786 = vmatprep.subr.bf16.mxu1 %v5335_v45 }
 0x141   :  { %2617 = vmatmul.mubr.bf16.gmra.mxu0 %v6543_v16  ;;  %2670 = vmatmul.mubr.bf16.gmra.mxu1 %v6548_v1 }
 0x142   :  { %v6551_v26 = vpop.f32.mrf.mxu0  ;;  %v6553_v49 = vpop.f32.mrf.mxu1  ;;  %2685 = vmatpush1.bf16.msra.mxu0 %v5285_v25  ;;  %2765 = vmatprep.mubr.bf16.mxu1 %v7577_v15  ;;  %v5311_v25 = vld [vmem:[%s7563_s3 + $0x5a4] ss:$16 sps:$4 sm:$0xff]  }
 0x143   :  { %2686 = vmatprep.subr.bf16.mxu0 %v5290_v48 }
 0x144   :  { %v6559_v2 = vpop.f32.mrf.mxu0  ;;  %v1104_v29 = vpop.f32.mrf.mxu1 }
 0x146   :  { %v6565_v39 = vpop.f32.mrf.mxu0  ;;  %v6567_v50 = vpop.f32.mrf.mxu1  ;;  %2687 = vmatpush1.bf16.msra.mxu0 %v5288_v28  ;;  %v5309_v28 = vld [vmem:[%s7563_s3 + $0x5a0] ss:$16 sps:$4 sm:$0xff]  }
 0x147   :  { %2688 = vmatprep.subr.bf16.mxu0 %v5293_v63 }
 0x148   :  { %v6572_v51 = vpop.f32.mrf.mxu0  ;;  %v1109_v52 = vpop.f32.mrf.mxu1 }
 0x14a   :  { %v6577_v6 = vpop.f32.mrf.mxu0  ;;  %v6579_v30 = vpop.f32.mrf.mxu1  ;;  %2689 = vmatpush1.bf16.msra.mxu0 %v5291_v3  ;;  %v5314_v3 = vld [vmem:[%s7563_s3 + $0x584] ss:$16 sps:$4 sm:$0xff]  }
 0x14b   :  { %2690 = vmatprep.subr.bf16.mxu0 %v5296_v5 }
 0x14c   :  { %v6584_v35 = vpop.f32.mrf.mxu0  ;;  %v1112_v57 = vpop.f32.mrf.mxu1 }
 0x14e   :  { %v6589_v9 = vpop.f32.mrf.mxu0  ;;  %v6591_v58 = vpop.f32.mrf.mxu1  ;;  %2691 = vmatpush1.bf16.msra.mxu0 %v5294_v31  ;;  %v5312_v31 = vld [vmem:[%s7563_s3 + $0x580] ss:$16 sps:$4 sm:$0xff]  }
 0x14f   :  { %2692 = vmatprep.subr.bf16.mxu0 %v5299_v36 }
 0x150   :  { %v6596_v19 = vpop.f32.mrf.mxu0  ;;  %v1117_v55 = vpop.f32.mrf.mxu1 }
 0x152   :  { %v6601_v8 = vpop.f32.mrf.mxu0  ;;  %v6603_v20 = vpop.f32.mrf.mxu1  ;;  %2693 = vmatpush1.bf16.msra.mxu0 %v5297_v10  ;;  %v5320_v10 = vld [vmem:[%s7563_s3 + $0x564] ss:$16 sps:$4 sm:$0xff]  }
 0x153   :  { %2694 = vmatprep.subr.bf16.mxu0 %v5302_v7 }
 0x154   :  { %v6608_v61 = vpop.f32.mrf.mxu0  ;;  %v1120_v12 = vpop.f32.mrf.mxu1 }
 0x156   :  { %v6613_v62 = vpop.f32.mrf.mxu0  ;;  %v1123_v32 = vpop.f32.mrf.mxu1  ;;  %2695 = vmatpush1.bf16.msra.mxu0 %v5300_v59  ;;  %v1266_v59 = vsub.s32 6, %v6379_v27 }
 0x157   :  { %2696 = vmatprep.subr.bf16.mxu0 %v5305_v41  ;;  %v5318_v41 = vld [vmem:[%s7563_s3 + $0x560] ss:$16 sps:$4 sm:$0xff]  }
 0x158   :  { %v1020_v0 = vpop.f32.mrf.mxu0  ;;  %v1125_v21 = vpop.f32.mrf.mxu1 }
 0x159   :  { %v1160_v21 = vmax.f32 %v6476_v53, %v6567_v50  ;;  %v6672_v53 = vrot.slane %v6393_v33, %v1266_v59  ;;  %v1166_v59 = vmax.f32 %v6517_v14, %v6584_v35  ;;  %v5327_v14 = vld [vmem:[%s7563_s3 + $0x520] ss:$16 sps:$4 sm:$0xff]   ;;  %v1174_v35 = vmax.f32 %v6527_v37, %v6591_v58 }
 0x15a   :  { %v1022_v46 = vpop.f32.mrf.mxu0  ;;  %v6621_v24 = vpop.f32.mrf.mxu1  ;;  %2697 = vmatpush2.bf16.msra.mxu0 %v5303_v13  ;;  %v1262_v13 = vsub.s32 5, %v6379_v27 }
 0x15b   :  { %2698 = vmatprep.subr.bf16.mxu0 %v5308_v23  ;;  %v1258_v23 = vsub.s32 4, %v6379_v27 }
 0x15c   :  { %v6626_v45 = vpop.f32.mrf.mxu0  ;;  %v1128_v40 = vpop.f32.mrf.mxu1 }
 0x15e   :  { %v6631_v47 = vpop.f32.mrf.mxu0  ;;  %v6633_v48 = vpop.f32.mrf.mxu1  ;;  %2699 = vmatpush2.bf16.msra.mxu0 %v5306_v34 }
 0x15f   :  { %2700 = vmatprep.subr.bf16.mxu0 %v5311_v25  ;;  %v5323_v25 = vld [vmem:[%s7563_s3 + $0x544] ss:$16 sps:$4 sm:$0xff]  }
 0x160   :  { %v6638_v29 = vpop.f32.mrf.mxu0  ;;  %v1133_v63 = vpop.f32.mrf.mxu1 }
 0x162   :  { %v6643_v52 = vpop.f32.mrf.mxu0  ;;  %v6645_v5 = vpop.f32.mrf.mxu1  ;;  %2701 = vmatpush2.bf16.msra.mxu0 %v5309_v28  ;;  %v1159_v28 = vmax.f32 %v6487_v56, %v6572_v51  ;;  %v5321_v56 = vld [vmem:[%s7563_s3 + $0x540] ss:$16 sps:$4 sm:$0xff]  }
 0x163   :  { %2702 = vmatprep.subr.bf16.mxu0 %v5314_v3 }
 0x164   :  { %v6650_v57 = vpop.f32.mrf.mxu0  ;;  %v1136_v36 = vpop.f32.mrf.mxu1 }
 0x166   :  { %v1038_v55 = vpop.f32.mrf.mxu0  ;;  %v1139_v7 = vpop.f32.mrf.mxu1  ;;  %2703 = vmatpush2.bf16.msra.mxu0 %v5312_v31 }
 0x167   :  { %v1188_v12 = vmax.f32 %v1123_v32, %v1139_v7  ;;  %2704 = vmatprep.subr.bf16.mxu0 %v5320_v10  ;;  %v1158_v32 = vmax.f32 %v6474_v4, %v6565_v39  ;;  %v1186_v63 = vmax.f32 %v6613_v62, %v1038_v55  ;;  %v1165_v10 = vmax.f32 %v6508_v60, %v6577_v6  ;;  %v5329_v60 = vld [vmem:[%s7563_s3 + $0x524] ss:$16 sps:$4 sm:$0xff]  }
 0x168   :  { %v1040_v34 = vpop.f32.mrf.mxu0  ;;  %v1141_v40 = vpop.f32.mrf.mxu1  ;;  %v1167_v39 = vmax.f32 %v6510_v11, %v6579_v30  ;;  %v6689_v55 = vrot.slane %v6393_v33, %v1258_v23 }
 0x169   :  { %v1187_v3 = vmax.f32 %v1020_v0, %v1040_v34  ;;  %v1216_v31 = vmax.f32 %v1160_v21, %v1188_v12  ;;  %v6677_v40 = vrot.slane %v6393_v33, %v1262_v13  ;;  %v1214_v6 = vmax.f32 %v1158_v32, %v1186_v63 }
 0x16a   :  { %v1042_v50 = vpop.f32.mrf.mxu0  ;;  %v1142_v36 = vpop.f32.mrf.mxu1  ;;  %2705 = vmatpush2.bf16.msra.mxu0 %v5318_v41  ;;  %v1172_v13 = vmax.f32 %v6525_v38, %v6589_v9  ;;  %v1179_v32 = vmax.f32 %v6551_v26, %v6601_v8  ;;  %v5330_v26 = vld [vmem:[%s7563_s3 + $0x500] ss:$16 sps:$4 sm:$0xff]   ;;  %v5333_v8 = vld [vmem:[%s7563_s3 + $0xe8] ss:$16 sps:$4 sm:$0xff]  }
 0x16b   :  { %v1215_v7 = vmax.f32 %v1159_v28, %v1187_v3  ;;  %v1193_v4 = vmax.f32 %v1022_v46, %v1042_v50  ;;  %v1195_v51 = vmax.f32 %v6621_v24, %v1142_v36  ;;  %2706 = vmatprep.subr.bf16.mxu0 %v5323_v25  ;;  %v1281_v11 = vadd.f32 %v6672_v53, %v1216_v31 }
 0x16c   :  { %v1044_v62 = vpop.f32.mrf.mxu0  ;;  %v1144_v0 = vpop.f32.mrf.mxu1  ;;  %v1279_v28 = vadd.f32 %v6689_v55, %v1214_v6  ;;  %v1181_v36 = vmax.f32 %v6553_v49, %v6603_v20  ;;  %v5338_v20 = vld [vmem:[%s7563_s3 + $0x2ec] ss:$16 sps:$4 sm:$0xff]  }
 0x16d   :  { %v1221_v46 = vmax.f32 %v1165_v10, %v1193_v4  ;;  %v1223_v30 = vmax.f32 %v1167_v39, %v1195_v51  ;;  %v1194_v24 = vmax.f32 %v6626_v45, %v1044_v62  ;;  %v1280_v21 = vadd.f32 %v6677_v40, %v1215_v7 }
 0x16e   :  { %v1048_v12 = vpop.f32.mrf.mxu0  ;;  %v1147_v41 = vpop.f32.mrf.mxu1  ;;  %2707 = vmatpush2.bf16.msra.mxu0 %v5321_v56  ;;  %v1173_v45 = vmax.f32 %v6541_v22, %v6596_v19  ;;  %v1309_v22 = vmax.f32 %v1281_v11, 0.0  ;;  %v1180_v62 = vmax.f32 %v6559_v2, %v6608_v61  ;;  %v1307_v0 = vmax.f32 %v1279_v28, 0.0  ;;  %v5336_v61 = vld [vmem:[%s7563_s3 + $0x2e8] ss:$16 sps:$4 sm:$0xff]  }
 0x16f   :  { %v1286_v33 = vadd.f32 %v6689_v55, %v1221_v46  ;;  %v1202_v23 = vmax.f32 %v6633_v48, %v1147_v41  ;;  %v1288_v34 = vadd.f32 %v6672_v53, %v1223_v30  ;;  %v1222_v38 = vmax.f32 %v1166_v59, %v1194_v24  ;;  %2708 = vmatprep.subr.bf16.mxu0 %v5329_v60  ;;  %v5332_v48 = vld [vmem:[%s7563_s3 + $0x504] ss:$16 sps:$4 sm:$0xff]   ;;  %v5348_v28 = vld [vmem:[%s7563_s3 + $0x2a8] ss:$16 sps:$4 sm:$0xff]  }
 0x170   :  { %v1050_v9 = vpop.f32.mrf.mxu0  ;;  %v1149_v25 = vpop.f32.mrf.mxu1  ;;  %v1200_v37 = vmax.f32 %v6631_v47, %v1048_v12  ;;  %v1308_v10 = vmax.f32 %v1280_v21, 0.0  ;;  %v5347_v21 = vld [vmem:[%s7563_s3 + $0xac] ss:$16 sps:$4 sm:$0xff]  }
 0x171   :  { %v1201_v58 = vmax.f32 %v6638_v29, %v1050_v9  ;;  %v1316_v19 = vmax.f32 %v1288_v34, 0.0  ;;  %v1287_v63 = vadd.f32 %v6677_v40, %v1222_v38  ;;  %v1230_v3 = vmax.f32 %v1174_v35, %v1202_v23  ;;  %v5342_v34 = vld [vmem:[%s7563_s3 + $0x2c8] ss:$16 sps:$4 sm:$0xff]   ;;  %v5350_v25 = vld [vmem:[%s7563_s3 + $0x2ac] ss:$16 sps:$4 sm:$0xff]  }
 0x172   :  { %v1052_v31 = vpop.f32.mrf.mxu0  ;;  %v1150_v50 = vpop.f32.mrf.mxu1  ;;  %v1314_v7 = vmax.f32 %v1286_v33, 0.0  ;;  %2709 = vmatpush2.bf16.msra.mxu0 %v5327_v14  ;;  %v1228_v60 = vmax.f32 %v1172_v13, %v1200_v37  ;;  %v5344_v13 = vld [vmem:[%s7563_s3 + $0x2cc] ss:$16 sps:$4 sm:$0xff]   ;;  %v5351_v37 = vld [vmem:[%s7563_s3 + $0x88] ss:$16 sps:$4 sm:$0xff]  }
 0x173   :  { %v1229_v4 = vmax.f32 %v1173_v45, %v1201_v58  ;;  %v6725_v47 = vpack.c.bf16 %v1316_v19, %v1309_v22  ;;  %v1315_v29 = vmax.f32 %v1287_v63, 0.0  ;;  %v1207_v56 = vmax.f32 %v6643_v52, %v1052_v31  ;;  %2710 = vmatprep.subr.bf16.mxu0 %v5332_v48  ;;  %v5341_v52 = vld [vmem:[%s7563_s3 + $0xcc] ss:$16 sps:$4 sm:$0xff]   ;;  %v5357_v63 = vld [vmem:[%s7563_s3 + $0x68] ss:$16 sps:$4 sm:$0xff]  }
 0x174   :  { %v1209_v39 = vmax.f32 %v6645_v5, %v1150_v50  ;;  %v1054_v49 = vpop.f32.mrf.mxu0  ;;  %v1152_v51 = vpop.f32.mrf.mxu1  ;;  %v1295_v5 = vadd.f32 %v6672_v53, %v1230_v3  ;;  %v6750_v24 = vpack.c.bf16 %v1314_v7, %v1307_v0  ;;  %v1293_v23 = vadd.f32 %v6689_v55, %v1228_v60  ;;  %v5353_v48 = vld [vmem:[%s7563_s3 + $0x8c] ss:$16 sps:$4 sm:$0xff]   ;;  %v5360_v50 = vld [vmem:[%s7563_s3 + $0x268] ss:$16 sps:$4 sm:$0xff]  }
 0x175   :  { %v1208_v6 = vmax.f32 %v6650_v57, %v1054_v49  ;;  %v1235_v46 = vmax.f32 %v1179_v32, %v1207_v56  ;;  %4644 = vmatmul.mubr.msk.bf16.vlgmr.msra.gmra.mxu1 %vm2567_vm1, %v6725_v47  ;;  %v6741_v11 = vpack.c.bf16 %v1315_v29, %v1308_v10  ;;  %v1294_v30 = vadd.f32 %v6677_v40, %v1229_v4  ;;  %v5339_v57 = vld [vmem:[%s7563_s3 + $0xc8] ss:$16 sps:$4 sm:$0xff]   ;;  %v5356_v22 = vld [vmem:[%s7563_s3 + $0x28c] ss:$16 sps:$4 sm:$0xff]  }
 0x176   :  { %v1237_v59 = vmax.f32 %v1181_v36, %v1209_v39  ;;  %2711 = vmatpush2.bf16.msra.mxu0 %v5330_v26  ;;  %2787 = vmatpush1.bf16.msra.mxu1 %v5333_v8  ;;  %v1323_v14 = vmax.f32 %v1295_v5, 0.0  ;;  %v1321_v32 = vmax.f32 %v1293_v23, 0.0  ;;  %v5359_v19 = vld [vmem:[%s7563_s3 + $0x6c] ss:$16 sps:$4 sm:$0xff]   ;;  %v5366_v7 = vld [vmem:[%s7563_s3 + $0x248] ss:$16 sps:$4 sm:$0xff]  }
 0x177   :  { %v1236_v2 = vmax.f32 %v1180_v62, %v1208_v6  ;;  %v1300_v12 = vadd.f32 %v6689_v55, %v1235_v46  ;;  %2712 = vmatprep.mubr.bf16.mxu0 %v6741_v11  ;;  %2839 = vmatprep.subr.bf16.mxu0 %v5338_v20  ;;  %v1322_v35 = vmax.f32 %v1294_v30, 0.0  ;;  %v5362_v3 = vld [vmem:[%s7563_s3 + $0x26c] ss:$16 sps:$4 sm:$0xff]   ;;  %v5369_v4 = vld [vmem:[%s7563_s3 + $0x28] ss:$16 sps:$4 sm:$0xff]  }
 0x178   :  { %v1302_v41 = vadd.f32 %v6672_v53, %v1237_v59  ;;  %2788 = vmatprep.subr.bf16.mxu1 %v5341_v52  ;;  %2775 = vmatprep.mubr.bf16.mxu1 %v7577_v15  ;;  %v5365_v31 = vld [vmem:[%s7563_s3 + $0x4c] ss:$16 sps:$4 sm:$0xff]   ;;  %v5372_v29 = vld [vmem:[%s7563_s3 + $0x228] ss:$16 sps:$4 sm:$0xff]  }
 0x179   :  { %v1301_v33 = vadd.f32 %v6677_v40, %v1236_v2  ;;  %2713 = vmatmul.mubr.bf16.vlgmr.msra.gmra.mxu0 %v6750_v24  ;;  %v5345_v40 = vld [vmem:[%s7563_s3 + $0xa8] ss:$16 sps:$4 sm:$0xff]   ;;  %v1328_v38 = vmax.f32 %v1300_v12, 0.0  ;;  %v5368_v36 = vld [vmem:[%s7563_s3 + $0x24c] ss:$16 sps:$4 sm:$0xff]  }
 0x17a   :  { %v1330_v53 = vmax.f32 %v1302_v41, 0.0  ;;  %2840 = vmatpush1.bf16.msra.mxu0 %v5336_v61  ;;  %2789 = vmatpush1.bf16.msra.mxu1 %v5339_v57  ;;  %v5371_v10 = vld [vmem:[%s7563_s3 + $0x2c] ss:$16 sps:$4 sm:$0xff]   ;;  %v5375_v56 = vld [vmem:[%s7563_s3 + $0x8] ss:$16 sps:$4 sm:$0xff]  }
 0x17b   :  { %v1329_v45 = vmax.f32 %v1301_v33, 0.0  ;;  %2841 = vmatprep.subr.bf16.mxu0 %v5344_v13  ;;  %2790 = vmatprep.subr.bf16.mxu1 %v5347_v21  ;;  %v6791_v58 = vpack.c.bf16 %v1328_v38, %v1321_v32  ;;  %v5374_v26 = vld [vmem:[%s7563_s3 + $0x22c] ss:$16 sps:$4 sm:$0xff]   ;;  %v5378_v20 = vld [vmem:[%s7563_s3 + $0x208] ss:$16 sps:$4 sm:$0xff]  }
 0x17c   :  { %v6771_v9 = vpack.c.bf16 %v1330_v53, %v1323_v14  ;;  %v5377_v8 = vld [vmem:[%s7563_s3 + $0xc] ss:$16 sps:$4 sm:$0xff]   ;;  %v5381_v51 = vld [vmem:[%s7563_s3 + $0x1e8] ss:$16 sps:$4 sm:$0xff]  }
 0x17d   :  { %v6773_v55 = vpack.c.bf16 %v1329_v45, %v1322_v35  ;;  %v5380_v39 = vld [vmem:[%s7563_s3 + $0x20c] ss:$16 sps:$4 sm:$0xff]   ;;  %v5384_v60 = vld [vmem:[%s7563_s3 + $0x3e8] ss:$16 sps:$4 sm:$0xff]  }
 0x17e   :  { %4645 = vmatmul.mubr.msk.bf16.gmra.mxu1 %vm2567_vm1, %v6771_v9  ;;  %2842 = vmatpush1.bf16.msra.mxu0 %v5342_v34  ;;  %v5383_v49 = vld [vmem:[%s7563_s3 + $0x1ec] ss:$16 sps:$4 sm:$0xff]   ;;  %v5387_v6 = vld [vmem:[%s7563_s3 + $0x1c8] ss:$16 sps:$4 sm:$0xff]  }
 0x17f   :  { %2791 = vmatpush1.bf16.msra.mxu1 %v5345_v40  ;;  %2818 = vmatprep.mubr.bf16.mxu1 %v6480_v54  ;;  %v5354_v54 = vld [vmem:[%s7563_s3 + $0x288] ss:$16 sps:$4 sm:$0xff]   ;;  %v5386_v62 = vld [vmem:[%s7563_s3 + $0x3ec] ss:$16 sps:$4 sm:$0xff]  }
 0x180   :  { %2722 = vmatprep.mubr.bf16.mxu0 %v6773_v55  ;;  %2843 = vmatprep.subr.bf16.mxu0 %v5350_v25  ;;  %v5389_v0 = vld [vmem:[%s7563_s3 + $0x1cc] ss:$16 sps:$4 sm:$0xff]   ;;  %v5390_v46 = vld [vmem:[%s7563_s3 + $0x3c8] ss:$16 sps:$4 sm:$0xff]  }
 0x181   :  { %2792 = vmatprep.subr.bf16.mxu1 %v5353_v48  ;;  %2723 = vmatmul.mubr.bf16.gmra.mxu0 %v6791_v58  ;;  %v5392_v52 = vld [vmem:[%s7563_s3 + $0x3cc] ss:$16 sps:$4 sm:$0xff]   ;;  %v5393_v59 = vld [vmem:[%s7563_s3 + $0x1a8] ss:$16 sps:$4 sm:$0xff]  }
 0x182   :  { %2844 = vmatpush1.bf16.msra.mxu0 %v5348_v28  ;;  %2871 = vmatprep.mubr.bf16.mxu0 %v6482_v42  ;;  %v5363_v42 = vld [vmem:[%s7563_s3 + $0x48] ss:$16 sps:$4 sm:$0xff]   ;;  %v5395_v5 = vld [vmem:[%s7563_s3 + $0x1ac] ss:$16 sps:$4 sm:$0xff]  }
 0x183   :  { %2793 = vmatpush1.bf16.msra.mxu1 %v5351_v37  ;;  %2845 = vmatprep.subr.bf16.mxu0 %v5356_v22  ;;  %v5398_v30 = vld [vmem:[%s7563_s3 + $0x3ac] ss:$16 sps:$4 sm:$0xff]   ;;  %v5396_v61 = vld [vmem:[%s7563_s3 + $0x3a8] ss:$16 sps:$4 sm:$0xff]  }
 0x184   :  { %2794 = vmatprep.subr.bf16.mxu1 %v5359_v19  ;;  %v5401_v2 = vld [vmem:[%s7563_s3 + $0x18c] ss:$16 sps:$4 sm:$0xff]   ;;  %v5399_v57 = vld [vmem:[%s7563_s3 + $0x188] ss:$16 sps:$4 sm:$0xff]  }
 0x185   :  { %v5404_v12 = vld [vmem:[%s7563_s3 + $0x38c] ss:$16 sps:$4 sm:$0xff]   ;;  %v5402_v13 = vld [vmem:[%s7563_s3 + $0x388] ss:$16 sps:$4 sm:$0xff]  }
 0x186   :  { %2846 = vmatpush1.bf16.msra.mxu0 %v5354_v54  ;;  %v5407_v41 = vld [vmem:[%s7563_s3 + $0x16c] ss:$16 sps:$4 sm:$0xff]   ;;  %v5405_v21 = vld [vmem:[%s7563_s3 + $0x168] ss:$16 sps:$4 sm:$0xff]  }
 0x187   :  { %2795 = vmatpush1.bf16.msra.mxu1 %v5357_v63  ;;  %2847 = vmatprep.subr.bf16.mxu0 %v5362_v3  ;;  %v5410_v33 = vld [vmem:[%s7563_s3 + $0x36c] ss:$16 sps:$4 sm:$0xff]   ;;  %v5408_v14 = vld [vmem:[%s7563_s3 + $0x368] ss:$16 sps:$4 sm:$0xff]  }
 0x188   :  { %2796 = vmatprep.subr.bf16.mxu1 %v5365_v31  ;;  %v5413_v23 = vld [vmem:[%s7563_s3 + $0x14c] ss:$16 sps:$4 sm:$0xff]   ;;  %v5411_v53 = vld [vmem:[%s7563_s3 + $0x148] ss:$16 sps:$4 sm:$0xff]  }
 0x189   :  { %v5416_v35 = vld [vmem:[%s7563_s3 + $0x34c] ss:$16 sps:$4 sm:$0xff]   ;;  %v5414_v34 = vld [vmem:[%s7563_s3 + $0x348] ss:$16 sps:$4 sm:$0xff]  }
 0x18a   :  { %2848 = vmatpush1.bf16.msra.mxu0 %v5360_v50  ;;  %v5419_v45 = vld [vmem:[%s7563_s3 + $0x12c] ss:$16 sps:$4 sm:$0xff]   ;;  %v5417_v40 = vld [vmem:[%s7563_s3 + $0x128] ss:$16 sps:$4 sm:$0xff]  }
 0x18b   :  { %2797 = vmatpush1.bf16.msra.mxu1 %v5363_v42  ;;  %2849 = vmatprep.subr.bf16.mxu0 %v5368_v36  ;;  %v5422_v38 = vld [vmem:[%s7563_s3 + $0x32c] ss:$16 sps:$4 sm:$0xff]   ;;  %v5420_v48 = vld [vmem:[%s7563_s3 + $0x328] ss:$16 sps:$4 sm:$0xff]   ;;  %v5483_v36 = vld [vmem:[%s7565_s5 + $0x140] sm:$0xff]  }
 0x18c   :  { %2798 = vmatprep.subr.bf16.mxu1 %v5371_v10  ;;  %v5425_v25 = vld [vmem:[%s7563_s3 + $0x10c] ss:$16 sps:$4 sm:$0xff]   ;;  %v5423_v32 = vld [vmem:[%s7563_s3 + $0x108] ss:$16 sps:$4 sm:$0xff]  }
 0x18d   :  { %v5428_v28 = vld [vmem:[%s7563_s3 + $0x30c] ss:$16 sps:$4 sm:$0xff]   ;;  %v5426_v22 = vld [vmem:[%s7563_s3 + $0x308] ss:$16 sps:$4 sm:$0xff]  }
 0x18e   :  { %2850 = vmatpush1.bf16.msra.mxu0 %v5366_v7  ;;  %v5431_v37 = vld [vmem:[%s7563_s3 + $0x4ec] ss:$16 sps:$4 sm:$0xff]   ;;  %v5429_v19 = vld [vmem:[%s7563_s3 + $0x4e8] ss:$16 sps:$4 sm:$0xff]   ;;  %v5484_v7 = vld [vmem:[%s7565_s5 + $0x100] sm:$0xff]  }
 0x18f   :  { %2799 = vmatpush1.bf16.msra.mxu1 %v5369_v4  ;;  %2851 = vmatprep.subr.bf16.mxu0 %v5374_v26  ;;  %v5440_v54 = vld [vmem:[%s7563_s3 + $0x62c] ss:$16 sps:$4 sm:$0xff]   ;;  %v5438_v3 = vld [vmem:[%s7563_s3 + $0x628] ss:$16 sps:$4 sm:$0xff]  }
 0x190   :  { %2800 = vmatprep.subr.bf16.mxu1 %v5377_v8  ;;  %v5434_v63 = vld [vmem:[%s7563_s3 + $0x4cc] ss:$16 sps:$4 sm:$0xff]   ;;  %v5432_v31 = vld [vmem:[%s7563_s3 + $0x4c8] ss:$16 sps:$4 sm:$0xff]  }
 0x191   :  { %v5437_v50 = vld [vmem:[%s7563_s3 + $0x4ac] ss:$16 sps:$4 sm:$0xff]  }
 0x192   :  { %2852 = vmatpush1.bf16.msra.mxu0 %v5372_v29  ;;  %v5446_v42 = vld [vmem:[%s7563_s3 + $0x60c] ss:$16 sps:$4 sm:$0xff]   ;;  %v5453_v29 = vld [vmem:[%s7563_s3 + $0x428] ss:$16 sps:$4 sm:$0xff]  }
 0x193   :  { %2801 = vmatpush1.bf16.msra.mxu1 %v5375_v56  ;;  %2853 = vmatprep.subr.bf16.mxu0 %v5380_v39  ;;  %v5443_v10 = vld [vmem:[%s7563_s3 + $0x48c] ss:$16 sps:$4 sm:$0xff]   ;;  %v5487_v56 = vld [vmem:[%s7565_s5 + $0x130] sm:$0xff]  }
 0x194   :  { %2802 = vmatprep.subr.bf16.mxu1 %v5383_v49  ;;  %v5455_v4 = vld [vmem:[%s7563_s3 + $0x42c] ss:$16 sps:$4 sm:$0xff]  }
 0x195   :  { %v5485_v26 = vld [vmem:[%s7565_s5 + $0x138] sm:$0xff]  }
 0x196   :  { %2854 = vmatpush1.bf16.msra.mxu0 %v5378_v20  ;;  %v5486_v8 = vld [vmem:[%s7565_s5 + $0xf8] sm:$0xff]   ;;  %v5488_v20 = vld [vmem:[%s7565_s5 + $0xf0] sm:$0xff]  }
 0x197   :  { %2803 = vmatpush2.bf16.msra.mxu1 %v5381_v51  ;;  %2855 = vmatprep.subr.bf16.mxu0 %v5386_v62  ;;  %v5458_v39 = vld [vmem:[%s7563_s3 + $0x40c] ss:$16 sps:$4 sm:$0xff]   ;;  %v5459_v62 = vld [vmem:[%s7563_s3 + $0x5e8] ss:$16 sps:$4 sm:$0xff]  }
 0x198   :  { %2804 = vmatprep.subr.bf16.mxu1 %v5389_v0  ;;  %v5461_v49 = vld [vmem:[%s7563_s3 + $0x5ec] ss:$16 sps:$4 sm:$0xff]  }
 0x199   :  { %v5489_v51 = vld [vmem:[%s7565_s5 + $0x128] sm:$0xff]  }
 0x19a   :  { %2856 = vmatpush2.bf16.msra.mxu0 %v5384_v60  ;;  %v5464_v0 = vld [vmem:[%s7563_s3 + $0x5cc] ss:$16 sps:$4 sm:$0xff]  }
 0x19b   :  { %2805 = vmatpush2.bf16.msra.mxu1 %v5387_v6  ;;  %2857 = vmatprep.subr.bf16.mxu0 %v5392_v52  ;;  %v5490_v60 = vld [vmem:[%s7565_s5 + $0xe8] sm:$0xff]   ;;  %v5491_v6 = vld [vmem:[%s7565_s5 + $0x120] sm:$0xff]  }
 0x19c   :  { %2806 = vmatprep.subr.bf16.mxu1 %v5395_v5  ;;  %v5462_v52 = vld [vmem:[%s7563_s3 + $0x5c8] ss:$16 sps:$4 sm:$0xff]  }
 0x19d   :  { %v5493_v5 = vld [vmem:[%s7565_s5 + $0x118] sm:$0xff]  }
 0x19e   :  { %2858 = vmatpush2.bf16.msra.mxu0 %v5390_v46  ;;  %v5467_v46 = vld [vmem:[%s7563_s3 + $0x5ac] ss:$16 sps:$4 sm:$0xff]  }
 0x19f   :  { %2807 = vmatpush2.bf16.msra.mxu1 %v5393_v59  ;;  %2859 = vmatprep.subr.bf16.mxu0 %v5398_v30  ;;  %v5494_v59 = vld [vmem:[%s7565_s5 + $0xd8] sm:$0xff]  }
 0x1a0   :  { %2808 = vmatprep.subr.bf16.mxu1 %v5401_v2  ;;  %v5465_v30 = vld [vmem:[%s7563_s3 + $0x5a8] ss:$16 sps:$4 sm:$0xff]   ;;  %v5495_v2 = vld [vmem:[%s7565_s5 + $0x110] sm:$0xff]  }
 0x1a2   :  { %2860 = vmatpush2.bf16.msra.mxu0 %v5396_v61  ;;  %v5470_v61 = vld [vmem:[%s7563_s3 + $0x58c] ss:$16 sps:$4 sm:$0xff]  }
 0x1a3   :  { %2809 = vmatpush2.bf16.msra.mxu1 %v5399_v57  ;;  %2861 = vmatprep.subr.bf16.mxu0 %v5404_v12  ;;  %v5496_v57 = vld [vmem:[%s7565_s5 + $0xd0] sm:$0xff]   ;;  %v5468_v12 = vld [vmem:[%s7563_s3 + $0x588] ss:$16 sps:$4 sm:$0xff]  }
 0x1a4   :  { %2810 = vmatprep.subr.bf16.mxu1 %v5407_v41  ;;  %v5497_v41 = vld [vmem:[%s7565_s5 + $0x108] sm:$0xff]  }
 0x1a6   :  { %2862 = vmatpush2.bf16.msra.mxu0 %v5402_v13  ;;  %v5473_v13 = vld [vmem:[%s7563_s3 + $0x56c] ss:$16 sps:$4 sm:$0xff]  }
 0x1a7   :  { %2811 = vmatpush2.bf16.msra.mxu1 %v5405_v21  ;;  %2863 = vmatprep.subr.bf16.mxu0 %v5410_v33  ;;  %v5498_v21 = vld [vmem:[%s7565_s5 + $0xc8] sm:$0xff]  }
 0x1a8   :  { %2812 = vmatprep.subr.bf16.mxu1 %v5413_v23  ;;  %v5471_v33 = vld [vmem:[%s7563_s3 + $0x568] ss:$16 sps:$4 sm:$0xff]  }
 0x1a9   :  { %v5499_v23 = vld [vmem:[%s7565_s5 + $0x78] sm:$0xff]  }
 0x1aa   :  { %2864 = vmatpush2.bf16.msra.mxu0 %v5408_v14  ;;  %v5476_v14 = vld [vmem:[%s7563_s3 + $0x54c] ss:$16 sps:$4 sm:$0xff]  }
 0x1ab   :  { %2813 = vmatpush2.bf16.msra.mxu1 %v5411_v53  ;;  %2865 = vmatprep.subr.bf16.mxu0 %v5416_v35  ;;  %v5474_v53 = vld [vmem:[%s7563_s3 + $0x548] ss:$16 sps:$4 sm:$0xff]   ;;  %v5479_v35 = vld [vmem:[%s7563_s3 + $0x52c] ss:$16 sps:$4 sm:$0xff]  }
 0x1ac   :  { %2814 = vmatprep.subr.bf16.mxu1 %v5419_v45  ;;  %v5477_v45 = vld [vmem:[%s7563_s3 + $0x528] ss:$16 sps:$4 sm:$0xff]  }
 0x1ae   :  { %2866 = vmatpush2.bf16.msra.mxu0 %v5414_v34  ;;  %v5482_v34 = vld [vmem:[%s7563_s3 + $0x50c] ss:$16 sps:$4 sm:$0xff]  }
 0x1af   :  { %2815 = vmatpush2.bf16.msra.mxu1 %v5417_v40  ;;  %2867 = vmatprep.subr.bf16.mxu0 %v5422_v38  ;;  %v5480_v40 = vld [vmem:[%s7563_s3 + $0x508] ss:$16 sps:$4 sm:$0xff]  }
 0x1b0   :  { %2816 = vmatprep.subr.bf16.mxu1 %v5425_v25 }
 0x1b2   :  { %2868 = vmatpush2.bf16.msra.mxu0 %v5420_v48 }
 0x1b3   :  { %2817 = vmatpush2.bf16.msra.mxu1 %v5423_v32  ;;  %2869 = vmatprep.subr.bf16.mxu0 %v5428_v28  ;;  %v7127_v28 = vld [vmem:[%s7566_s4] sm:$0xf] }
 0x1b4   :  { %2892 = vmatprep.subr.bf16.mxu1 %v5431_v37 }
 0x1b6   :  { %2819 = vmatmul.mubr.bf16.vlgmr.msra.gmra.mxu1 %v6468_v17  ;;  %2870 = vmatpush2.bf16.msra.mxu0 %v5426_v22  ;;  %v5444_v17 = vld [vmem:[%s7563_s3 + $0x608] ss:$16 sps:$4 sm:$0xff]  }
 0x1b7   :  { %2828 = vmatprep.mubr.bf16.mxu1 %v6529_v43  ;;  %2893 = vmatpush1.bf16.msra.mxu1 %v5429_v19  ;;  %v5435_v43 = vld [vmem:[%s7563_s3 + $0x4a8] ss:$16 sps:$4 sm:$0xff]  }
 0x1b8   :  { %2957 = vmatprep.subr.bf16.mxu0 %v5440_v54  ;;  %2894 = vmatprep.subr.bf16.mxu1 %v5434_v63 }
 0x1b9   :  { %2872 = vmatmul.mubr.bf16.vlgmr.msra.gmra.mxu0 %v6495_v18  ;;  %v5441_v18 = vld [vmem:[%s7563_s3 + $0x488] ss:$16 sps:$4 sm:$0xff]  }
 0x1ba   :  { %2881 = vmatprep.mubr.bf16.mxu0 %v6531_v44  ;;  %2958 = vmatpush1.bf16.msra.mxu0 %v5438_v3  ;;  %v5449_v44 = vld [vmem:[%s7563_s3 + $0x46c] ss:$16 sps:$4 sm:$0xff]  }
 0x1bb   :  { %2895 = vmatpush1.bf16.msra.mxu1 %v5432_v31  ;;  %2959 = vmatprep.subr.bf16.mxu0 %v5446_v42 }
 0x1bc   :  { %2896 = vmatprep.subr.bf16.mxu1 %v5437_v50 }
 0x1be   :  { %2829 = vmatmul.mubr.bf16.gmra.mxu1 %v6543_v16  ;;  %2960 = vmatpush1.bf16.msra.mxu0 %v5444_v17  ;;  %v5447_v16 = vld [vmem:[%s7563_s3 + $0x468] ss:$16 sps:$4 sm:$0xff]  }
 0x1bf   :  { %2924 = vmatprep.mubr.bf16.mxu1 %v6741_v11  ;;  %2897 = vmatpush1.bf16.msra.mxu1 %v5435_v43  ;;  %v5452_v11 = vld [vmem:[%s7563_s3 + $0x44c] ss:$16 sps:$4 sm:$0xff]  }
 0x1c0   :  { %4912 = vmatprep.subr.bf16.mxu0 %v5483_v36  ;;  %2898 = vmatprep.subr.bf16.mxu1 %v5443_v10 }
 0x1c1   :  { %2882 = vmatmul.mubr.bf16.gmra.mxu0 %v6548_v1  ;;  %v5450_v1 = vld [vmem:[%s7563_s3 + $0x448] ss:$16 sps:$4 sm:$0xff]  }
 0x1c2   :  { %2977 = vmatprep.mubr.bf16.mxu0 %v7577_v15 }
 0x1c3   :  { %2899 = vmatpush1.bf16.msra.mxu1 %v5441_v18 }
 0x1c4   :  { %2900 = vmatprep.subr.bf16.mxu1 %v5449_v44 }
 0x1c7   :  { %2901 = vmatpush1.bf16.msra.mxu1 %v5447_v16 }
 0x1c8   :  { %2902 = vmatprep.subr.bf16.mxu1 %v5452_v11 }
 0x1c9   :  { %4646 = vmatmul.mubr.msk.bf16.vlgmr.msra.gmra.mxu0 %vm2567_vm1, %v6725_v47  ;;  %v5456_v47 = vld [vmem:[%s7563_s3 + $0x408] ss:$16 sps:$4 sm:$0xff]  }
 0x1ca   :  { %2987 = vmatprep.mubr.bf16.mxu0 %v7577_v15  ;;  %4913 = vmatpush3.bf16.msra.mxu0 %v5484_v7 }
 0x1cb   :  { %2903 = vmatpush1.bf16.msra.mxu1 %v5450_v1  ;;  %4914 = vmatprep.subr.bf16.mxu0 %v5485_v26  ;;  %v5547_v26 = vld [vmem:[%s7565_s5 + $0x178] sm:$0xff]  }
 0x1cc   :  { %2904 = vmatprep.subr.bf16.mxu1 %v5455_v4  ;;  %v5544_v4 = vld [vmem:[%s7565_s5 + $0x180] sm:$0xff]  }
 0x1ce   :  { %4915 = vmatpush3.bf16.msra.mxu0 %v5486_v8  ;;  %v5549_v8 = vld [vmem:[%s7565_s5 + $0x170] sm:$0xff]  }
 0x1cf   :  { %2905 = vmatpush1.bf16.msra.mxu1 %v5453_v29  ;;  %4916 = vmatprep.subr.bf16.mxu0 %v5487_v56  ;;  %v5550_v29 = vld [vmem:[%s7565_s5 + $0x168] sm:$0xff]   ;;  %v5551_v56 = vld [vmem:[%s7565_s5 + $0x160] sm:$0xff]  }
 0x1d0   :  { %2906 = vmatprep.subr.bf16.mxu1 %v5458_v39  ;;  %v5552_v39 = vld [vmem:[%s7565_s5 + $0x158] sm:$0xff]  }
 0x1d1   :  { %4647 = vmatmul.mubr.msk.bf16.gmra.mxu0 %vm2567_vm1, %v6771_v9  ;;  %v5492_v9 = vld [vmem:[%s7565_s5 + $0xe0] sm:$0xff]  }
 0x1d2   :  { %4917 = vmatpush3.bf16.msra.mxu0 %v5488_v20 }
 0x1d3   :  { %2907 = vmatpush1.bf16.msra.mxu1 %v5456_v47  ;;  %4918 = vmatprep.subr.bf16.mxu0 %v5489_v51  ;;  %v5553_v51 = vld [vmem:[%s7565_s5 + $0x150] sm:$0xff]  }
 0x1d4   :  { %2908 = vmatprep.subr.bf16.mxu1 %v5461_v49 }
 0x1d6   :  { %4919 = vmatpush3.bf16.msra.mxu0 %v5490_v60 }
 0x1d7   :  { %2909 = vmatpush2.bf16.msra.mxu1 %v5459_v62  ;;  %4920 = vmatprep.subr.bf16.mxu0 %v5491_v6 }
 0x1d8   :  { %2910 = vmatprep.subr.bf16.mxu1 %v5464_v0 }
 0x1da   :  { %4921 = vmatpush3.bf16.msra.mxu0 %v5492_v9 }
 0x1db   :  { %2911 = vmatpush2.bf16.msra.mxu1 %v5462_v52  ;;  %4922 = vmatprep.subr.bf16.mxu0 %v5493_v5 }
 0x1dc   :  { %2912 = vmatprep.subr.bf16.mxu1 %v5467_v46  ;;  %v5554_v46 = vld [vmem:[%s7565_s5 + $0x148] sm:$0xff]  }
 0x1de   :  { %4923 = vmatpush3.bf16.msra.mxu0 %v5494_v59 }
 0x1df   :  { %2913 = vmatpush2.bf16.msra.mxu1 %v5465_v30  ;;  %4924 = vmatprep.subr.bf16.mxu0 %v5495_v2 }
 0x1e0   :  { %2914 = vmatprep.subr.bf16.mxu1 %v5470_v61 }
 0x1e2   :  { %4925 = vmatpush3.bf16.msra.mxu0 %v5496_v57 }
 0x1e3   :  { %2915 = vmatpush2.bf16.msra.mxu1 %v5468_v12  ;;  %4926 = vmatprep.subr.bf16.mxu0 %v5497_v41 }
 0x1e4   :  { %2916 = vmatprep.subr.bf16.mxu1 %v5473_v13 }
 0x1e6   :  { %4927 = vmatpush3.bf16.msra.mxu0 %v5498_v21  ;;  %v5555_v21 = vld [vmem:[%s7565_s5 + $0x188] sm:$0xff]  }
 0x1e7   :  { %2917 = vmatpush2.bf16.msra.mxu1 %v5471_v33  ;;  %4934 = vmatprep.subr.bf16.mxu0 %v5499_v23 }
 0x1e8   :  { %2918 = vmatprep.subr.bf16.mxu1 %v5476_v14 }
 0x1eb   :  { %2919 = vmatpush2.bf16.msra.mxu1 %v5474_v53 }
 0x1ec   :  { %2920 = vmatprep.subr.bf16.mxu1 %v5479_v35 }
 0x1ef   :  { %2921 = vmatpush2.bf16.msra.mxu1 %v5477_v45 }
 0x1f0   :  { %2922 = vmatprep.subr.bf16.mxu1 %v5482_v34  ;;  %v5500_v34 = vld [vmem:[%s7565_s5 + $0x38] sm:$0xff]  }
 0x1f3   :  { %2923 = vmatpush2.bf16.msra.mxu1 %v5480_v40 }
 0x1f4   :  { %3317 = vmatprep.subr.bf16.mxu1 %v7577_v15 }
 0x1f6   :  { %2925 = vmatmul.mubr.bf16.vlgmr.msra.gmra.mxu1 %v6750_v24  ;;  %v7578_v24 = vsub.s32 0, %v6379_v27 }
 0x1f7   :  { %2934 = vmatprep.mubr.bf16.mxu1 %v6773_v55  ;;  %3318 = vmatpush1.bf16.msra.mxu1 %v5544_v4 }
 0x1f8   :  { %v7133_v55 = vrot.slane %v7127_v28, %v7578_v24  ;;  %3319 = vmatprep.subr.bf16.mxu1 %v7577_v15  ;;  %v5505_v24 = vld [vmem:[%s7565_s5 + $0x60] sm:$0xff]  }
 0x1f9   :  { %v7120_v38 = vpop.f32.mrf.mxu0  ;;  %v7122_v25 = vpop.f32.mrf.mxu1 }
 0x1fb   :  { %v2610_v48 = vpop.f32.mrf.mxu0  ;;  %v2663_v32 = vpop.f32.mrf.mxu1  ;;  %3320 = vmatpush1.bf16.msra.mxu1 %v5547_v26  ;;  %v5513_v26 = vld [vmem:[%s7565_s5 + $0x40] sm:$0xff]  }
 0x1fc   :  { %3321 = vmatprep.subr.bf16.mxu1 %v7577_v15 }
 0x1fd   :  { %v2612_v37 = vpop.f32.mrf.mxu0  ;;  %v2665_v22 = vpop.f32.mrf.mxu1 }
 0x1fe   :  { %2935 = vmatmul.mubr.bf16.gmra.mxu1 %v6791_v58  ;;  %v7579_v58 = vsub.s32 1, %v6379_v27  ;;  %v2613_v20 = vadd.f32 %v2612_v37, %v7133_v55  ;;  %v5502_v37 = vld [vmem:[%s7565_s5 + $0x30] sm:$0xff]  }
 0x1ff   :  { %v2614_v19 = vpop.f32.mrf.mxu0  ;;  %v2667_v54 = vpop.f32.mrf.mxu1  ;;  %3322 = vmatpush1.bf16.msra.mxu1 %v5549_v8 }
 0x200   :  { %v7145_v36 = vrot.slane %v7127_v28, %v7579_v58  ;;  %3323 = vmatprep.subr.bf16.mxu1 %v7577_v15  ;;  %v2666_v52 = vadd.f32 %v2665_v22, %v2613_v20  ;;  %v5503_v22 = vld [vmem:[%s7565_s5 + $0x68] sm:$0xff]   ;;  %v5508_v58 = vld [vmem:[%s7565_s5 + $0x18] sm:$0xff]  }
 0x201   :  { %v2618_v63 = vpop.f32.mrf.mxu0  ;;  %v2671_v31 = vpop.f32.mrf.mxu1 }
 0x202   :  { %v2619_v3 = vadd.f32 %v2618_v63, %v7133_v55  ;;  %v2611_v49 = vadd.f32 %v2610_v48, %v7145_v36  ;;  %v2615_v6 = vadd.f32 %v2614_v19, %v7145_v36  ;;  %v5501_v48 = vld [vmem:[%s7565_s5 + $0x70] sm:$0xff]   ;;  %v5504_v19 = vld [vmem:[%s7565_s5 + $0x28] sm:$0xff]   ;;  %v5507_v63 = vld [vmem:[%s7565_s5 + $0x58] sm:$0xff]  }
 0x203   :  { %v7136_v50 = vpop.f32.mrf.mxu0  ;;  %v7140_v17 = vpop.f32.mrf.mxu1  ;;  %3324 = vmatpush1.bf16.msra.mxu1 %v5550_v29  ;;  %v5514_v29 = vld [vmem:[%s7565_s5] sm:$0xff]  }
 0x204   :  { %v7138_v42 = vadd.f32 %v2671_v31, %v2619_v3  ;;  %3325 = vmatprep.subr.bf16.mxu1 %v7577_v15  ;;  %v2664_v60 = vadd.f32 %v2663_v32, %v2611_v49  ;;  %v2668_v2 = vadd.f32 %v2667_v54, %v2615_v6  ;;  %v5506_v54 = vld [vmem:[%s7565_s5 + $0x20] sm:$0xff]   ;;  %v2609_v3 = vadd.f32 %v7120_v38, %v7133_v55  ;;  %v5520_v6 = vld [vmem:[%s7565_s5 + $0x1b8] sm:$0xff]  }
 0x205   :  { %v2622_v43 = vpop.f32.mrf.mxu0  ;;  %v2675_v18 = vpop.f32.mrf.mxu1 }
 0x206   :  { %v2623_v10 = vadd.f32 %v2622_v43, %v7133_v55  ;;  %v2621_v43 = vadd.f32 %v7136_v50, %v7145_v36  ;;  %v5510_v55 = vld [vmem:[%s7565_s5 + $0x10] sm:$0xff]  }
 0x207   :  { %v2624_v44 = vpop.f32.mrf.mxu0  ;;  %v2677_v7 = vpop.f32.mrf.mxu1  ;;  %3326 = vmatpush1.bf16.msra.mxu1 %v5551_v56 }
 0x208   :  { %v7148_v16 = vadd.f32 %v2675_v18, %v2623_v10  ;;  %v2625_v11 = vadd.f32 %v2624_v44, %v7145_v36  ;;  %3327 = vmatprep.subr.bf16.mxu1 %v7577_v15  ;;  %v5509_v10 = vld [vmem:[%s7565_s5 + $0x50] sm:$0xff]   ;;  %v2662_v18 = vadd.f32 %v7122_v25, %v2609_v3  ;;  %v2674_v38 = vadd.f32 %v7140_v17, %v2621_v43  ;;  %v5512_v25 = vld [vmem:[%s7565_s5 + $0x8] sm:$0xff]  }
 0x20a   :  { %v7151_v1 = vadd.f32 %v2677_v7, %v2625_v11  ;;  %v5511_v11 = vld [vmem:[%s7565_s5 + $0x48] sm:$0xff]  }
 0x20b   :  { %3328 = vmatpush1.bf16.msra.mxu1 %v5552_v39  ;;  %v5515_v39 = vld [vmem:[%s7565_s5 + $0x208] sm:$0xff]  }
 0x20c   :  { %3329 = vmatprep.subr.bf16.mxu1 %v7577_v15 }
 0x20f   :  { %3330 = vmatpush1.bf16.msra.mxu1 %v5553_v51  ;;  %v5517_v51 = vld [vmem:[%s7565_s5 + $0x200] sm:$0xff]  }
 0x210   :  { %3331 = vmatprep.subr.bf16.mxu1 %v7577_v15 }
 0x213   :  { %3332 = vmatpush1.bf16.msra.mxu1 %v5554_v46 }
 0x214   :  { %3347 = vmatprep.subr.bf16.mxu1 %v7577_v15 }
 0x217   :  { %3348 = vmatpush2.bf16.msra.mxu1 %v5555_v21 }
 0x218   :  { %3550 = vmatprep.subr.bf16.mxu1 %v7577_v15 }
 0x235   :  { %v7176_v47 = vpop.f32.mrf.mxu1 }
 0x237   :  { %v2769_v62 = vpop.f32.mrf.mxu1 }
 0x239   :  { %v2714_v0 = vpop.f32.mrf.mxu0  ;;  %v2771_v59 = vpop.f32.mrf.mxu1 }
 0x23a   :  { %v2715_v50 = vadd.f32 %v2714_v0, %v2662_v18  ;;  %v5518_v0 = vld [vmem:[%s7565_s5 + $0x1c0] sm:$0xff]   ;;  %v5530_v18 = vld [vmem:[%s7565_s5 + $0x190] sm:$0xff]  }
 0x23b   :  { %v2716_v9 = vpop.f32.mrf.mxu0  ;;  %v2773_v33 = vpop.f32.mrf.mxu1 }
 0x23c   :  { %v2717_v5 = vadd.f32 %v2716_v9, %v2664_v60  ;;  %v2768_v17 = vadd.f32 %v7176_v47, %v2715_v50  ;;  %v5516_v47 = vld [vmem:[%s7565_s5 + $0x1c8] sm:$0xff]   ;;  %v5519_v60 = vld [vmem:[%s7565_s5 + $0x1f8] sm:$0xff]  }
 0x23d   :  { %v2718_v30 = vpop.f32.mrf.mxu0 }
 0x23e   :  { %v2719_v61 = vadd.f32 %v2718_v30, %v2666_v52  ;;  %v2770_v12 = vadd.f32 %v2769_v62, %v2717_v5  ;;  %v7235_v36 = vpop.f32.mrf.mxu1  ;;  %v2998_v56 = vmax.f32 %v2768_v17, 0.0  ;;  %v5521_v52 = vld [vmem:[%s7565_s5 + $0x1f0] sm:$0xff]   ;;  %v5523_v30 = vld [vmem:[%s7565_s5 + $0x1e8] sm:$0xff]  }
 0x23f   :  { %v2720_v57 = vpop.f32.mrf.mxu0  ;;  %v5522_v5 = vld [vmem:[%s7565_s5 + $0x1b0] sm:$0xff]  }
 0x240   :  { %v2772_v41 = vadd.f32 %v2771_v59, %v2719_v61  ;;  %v2721_v13 = vadd.f32 %v2720_v57, %v2668_v2  ;;  %v2999_v53 = vmax.f32 %v2770_v12, 0.0  ;;  %v2779_v4 = vpop.f32.mrf.mxu1  ;;  %v3014_v20 = vpack.c.bf16 %v2998_v56, %v2998_v56  ;;  %v5524_v61 = vld [vmem:[%s7565_s5 + $0x1a8] sm:$0xff]   ;;  %v5535_v56 = vld [vmem:[%s7565_s5 + $0x2c0] sm:$0xff]  }
 0x241   :  { %v7220_v31 = vpop.f32.mrf.mxu0 }
 0x242   :  { %v2774_v23 = vadd.f32 %v2773_v33, %v2721_v13  ;;  %v3002_v14 = vmax.f32 %v2772_v41, 0.0  ;;  %v3015_v32 = vpack.c.bf16 %v2999_v53, %v2999_v53  ;;  %v7268_v9 = vpop.f32.mrf.mxu1  ;;  %v5525_v41 = vld [vmem:[%s7565_s5 + $0x1e0] sm:$0xff]  }
 0x243   :  { %v2726_v44 = vpop.f32.mrf.mxu0  ;;  %v5526_v33 = vld [vmem:[%s7565_s5 + $0x1a0] sm:$0xff]  }
 0x244   :  { %v3003_v35 = vmax.f32 %v2774_v23, 0.0  ;;  %v3068_v40 = vpack.c.bf16 %v3002_v14, %v3002_v14  ;;  %v2727_v7 = vadd.f32 %v2726_v44, %v2674_v38  ;;  %v2783_v46 = vpop.f32.mrf.mxu1  ;;  %v2725_v23 = vadd.f32 %v7220_v31, %v7138_v42 }
 0x245   :  { %v7276_v59 = vpop.f32.mrf.mxu0  ;;  %v7581_v31 = vsub.s32 3, %v6379_v27 }
 0x246   :  { %v3069_v45 = vpack.c.bf16 %v3003_v35, %v3003_v35  ;;  %v2780_v8 = vadd.f32 %v2779_v4, %v2727_v7  ;;  %v5527_v35 = vld [vmem:[%s7565_s5 + $0x1d8] sm:$0xff]   ;;  %v5532_v7 = vld [vmem:[%s7565_s5 + $0x290] sm:$0xff]   ;;  %v5533_v4 = vld [vmem:[%s7565_s5 + $0x2c8] sm:$0xff]  }
 0x247   :  { %v2730_v57 = vpop.f32.mrf.mxu0  ;;  %v7330_v43 = vrot.slane %v7127_v28, %v7581_v31 }
 0x248   :  { %3309 = vmatprep.mubr.bf16.mxu0 %v3069_v45  ;;  %v3007_v49 = vmax.f32 %v2780_v8, 0.0  ;;  %v2731_v45 = vadd.f32 %v2730_v57, %v7151_v1 }
 0x249   :  { %3310 = vmatmul.mubr.bf16.vlgmr.msra.gmra.mxu0 %v3068_v40 }
 0x24a   :  { %4935 = vmatpush3.bf16.msra.mxu0 %v5500_v34  ;;  %3542 = vmatprep.mubr.bf16.mxu0 %v3015_v32  ;;  %v3591_v62 = vpack.c.bf16 %v3007_v49, %v3007_v49  ;;  %v7580_v34 = vsub.s32 2, %v6379_v27  ;;  %v5531_v27 = vld [vmem:[%s7565_s5 + $0x2d0] sm:$0xff]   ;;  %v5537_v49 = vld [vmem:[%s7565_s5 + $0x2b8] sm:$0xff]  }
 0x24b   :  { %4936 = vmatprep.subr.bf16.mxu0 %v5501_v48 }
 0x24c   :  { %v7311_v40 = vrot.slane %v7127_v28, %v7580_v34 }
 0x24e   :  { %4937 = vmatpush3.bf16.msra.mxu0 %v5502_v37  ;;  %v5528_v37 = vld [vmem:[%s7565_s5 + $0x198] sm:$0xff]  }
 0x24f   :  { %4938 = vmatprep.subr.bf16.mxu0 %v5503_v22  ;;  %v2778_v22 = vadd.f32 %v7235_v36, %v2725_v23 }
 0x251   :  { %v3006_v44 = vmax.f32 %v2778_v22, 0.0 }
 0x252   :  { %4939 = vmatpush3.bf16.msra.mxu0 %v5504_v19 }
 0x253   :  { %4940 = vmatprep.subr.bf16.mxu0 %v5505_v24  ;;  %v5529_v24 = vld [vmem:[%s7565_s5 + $0x1d0] sm:$0xff]  }
 0x256   :  { %4941 = vmatpush3.bf16.msra.mxu0 %v5506_v54  ;;  %v2784_v54 = vadd.f32 %v2783_v46, %v2731_v45  ;;  %v5546_v46 = vld [vmem:[%s7565_s5 + $0x298] sm:$0xff]  }
 0x257   :  { %4942 = vmatprep.subr.bf16.mxu0 %v5507_v63 }
 0x258   :  { %v3011_v28 = vmax.f32 %v2784_v54, 0.0 }
 0x25a   :  { %4943 = vmatpush3.bf16.msra.mxu0 %v5508_v58 }
 0x25b   :  { %4944 = vmatprep.subr.bf16.mxu0 %v5509_v10 }
 0x25e   :  { %4945 = vmatpush3.bf16.msra.mxu0 %v5510_v55 }
 0x25f   :  { %4946 = vmatprep.subr.bf16.mxu0 %v5511_v11 }
 0x262   :  { %4947 = vmatpush3.bf16.msra.mxu0 %v5512_v25  ;;  %v3590_v25 = vpack.c.bf16 %v3006_v44, %v3006_v44 }
 0x263   :  { %4948 = vmatprep.subr.bf16.mxu0 %v5513_v26  ;;  %v3880_v26 = vpack.c.bf16 %v3011_v28, %v3011_v28  ;;  %v5559_v28 = vld [vmem:[%s7565_s5 + $0xa0] sm:$0xff]  }
 0x266   :  { %4949 = vmatpush3.bf16.msra.mxu0 %v5514_v29  ;;  %v5534_v29 = vld [vmem:[%s7565_s5 + $0x288] sm:$0xff]  }
 0x267   :  { %4956 = vmatprep.subr.bf16.mxu0 %v5515_v39  ;;  %v5536_v39 = vld [vmem:[%s7565_s5 + $0x280] sm:$0xff]  }
 0x269   :  { %3543 = vmatmul.mubr.bf16.vlgmr.msra.gmra.mxu0 %v3014_v20  ;;  %v5539_v20 = vld [vmem:[%s7565_s5 + $0x2b0] sm:$0xff]  }
 0x26a   :  { %4957 = vmatpush3.bf16.msra.mxu0 %v5516_v47  ;;  %3830 = vmatprep.mubr.bf16.mxu0 %v3591_v62  ;;  %v5538_v47 = vld [vmem:[%s7565_s5 + $0x278] sm:$0xff]   ;;  %v5541_v62 = vld [vmem:[%s7565_s5 + $0x2a8] sm:$0xff]  }
 0x26b   :  { %4958 = vmatprep.subr.bf16.mxu0 %v5517_v51  ;;  %v5540_v51 = vld [vmem:[%s7565_s5 + $0x270] sm:$0xff]  }
 0x26e   :  { %4959 = vmatpush3.bf16.msra.mxu0 %v5518_v0  ;;  %v5542_v0 = vld [vmem:[%s7565_s5 + $0x268] sm:$0xff]  }
 0x26f   :  { %4960 = vmatprep.subr.bf16.mxu0 %v5519_v60  ;;  %v2729_v60 = vadd.f32 %v7276_v59, %v7148_v16  ;;  %v5548_v16 = vld [vmem:[%s7565_s5 + $0x258] sm:$0xff]  }
 0x272   :  { %4961 = vmatpush3.bf16.msra.mxu0 %v5520_v6  ;;  %v5543_v6 = vld [vmem:[%s7565_s5 + $0x2a0] sm:$0xff]  }
 0x273   :  { %4962 = vmatprep.subr.bf16.mxu0 %v5521_v52  ;;  %v5545_v52 = vld [vmem:[%s7565_s5 + $0x260] sm:$0xff]  }
 0x276   :  { %v7281_v2 = vpop.f32.mrf.mxu1  ;;  %4963 = vmatpush3.bf16.msra.mxu0 %v5522_v5  ;;  %v2782_v5 = vadd.f32 %v7268_v9, %v2729_v60  ;;  %v5566_v60 = vld [vmem:[%s7565_s5 + $0x240] sm:$0xff]  }
 0x277   :  { %4964 = vmatprep.subr.bf16.mxu0 %v5523_v30 }
 0x278   :  { %v7286_v12 = vpop.f32.mrf.mxu1  ;;  %v3010_v59 = vmax.f32 %v2782_v5, 0.0  ;;  %v5569_v5 = vld [vmem:[%s7565_s5 + $0x228] sm:$0xff]  }
 0x279   :  { %v7291_v13 = vpop.f32.mrf.mxu0  ;;  %v2823_v57 = vadd.f32 %v7286_v12, %v7330_v43 }
 0x27a   :  { %v7293_v21 = vpop.f32.mrf.mxu1  ;;  %4965 = vmatpush3.bf16.msra.mxu0 %v5524_v61  ;;  %v3879_v30 = vpack.c.bf16 %v3010_v59, %v3010_v59 }
 0x27b   :  { %v7300_v14 = vpop.f32.mrf.mxu0  ;;  %4966 = vmatprep.subr.bf16.mxu0 %v5525_v41  ;;  %v2825_v9 = vadd.f32 %v7293_v21, %v7311_v40 }
 0x27c   :  { %v7302_v53 = vpop.f32.mrf.mxu1  ;;  %v2876_v23 = vadd.f32 %v7300_v14, %v2823_v57 }
 0x27d   :  { %v7313_v48 = vpop.f32.mrf.mxu0 }
 0x27e   :  { %v2830_v32 = vpop.f32.mrf.mxu1  ;;  %4967 = vmatpush3.bf16.msra.mxu0 %v5526_v33  ;;  %v2878_v34 = vadd.f32 %v7313_v48, %v2825_v9  ;;  %v5556_v48 = vld [vmem:[%s7565_s5 + $0xb8] sm:$0xff]  }
 0x27f   :  { %v2831_v42 = vadd.f32 %v2830_v32, %v7311_v40  ;;  %v7320_v19 = vpop.f32.mrf.mxu0  ;;  %4968 = vmatprep.subr.bf16.mxu0 %v5527_v35  ;;  %v2827_v35 = vadd.f32 %v7302_v53, %v7330_v43 }
 0x280   :  { %v7322_v1 = vpop.f32.mrf.mxu1 }
 0x281   :  { %v2883_v63 = vpop.f32.mrf.mxu0  ;;  %v2880_v22 = vadd.f32 %v7320_v19, %v2827_v35  ;;  %v5557_v19 = vld [vmem:[%s7565_s5 + $0xb0] sm:$0xff]  }
 0x282   :  { %v2834_v3 = vpop.f32.mrf.mxu1  ;;  %v7332_v58 = vadd.f32 %v2883_v63, %v2831_v42  ;;  %4969 = vmatpush3.bf16.msra.mxu0 %v5528_v37 }
 0x283   :  { %v2835_v10 = vadd.f32 %v2834_v3, %v7311_v40  ;;  %v7338_v38 = vpop.f32.mrf.mxu0  ;;  %4970 = vmatprep.subr.bf16.mxu0 %v5529_v24 }
 0x284   :  { %v2836_v55 = vpop.f32.mrf.mxu1 }
 0x285   :  { %v2837_v50 = vadd.f32 %v2836_v55, %v7330_v43  ;;  %v2887_v36 = vpop.f32.mrf.mxu0 }
 0x286   :  { %v7344_v11 = vadd.f32 %v2887_v36, %v2835_v10  ;;  %4971 = vmatpush3.bf16.msra.mxu0 %v5530_v18  ;;  %v2821_v36 = vadd.f32 %v7281_v2, %v7311_v40  ;;  %v5562_v2 = vld [vmem:[%s7565_s5 + $0x88] sm:$0xff]  }
 0x287   :  { %v2889_v17 = vpop.f32.mrf.mxu0  ;;  %4978 = vmatprep.subr.bf16.mxu0 %v5531_v27  ;;  %v5558_v27 = vld [vmem:[%s7565_s5 + $0xa8] sm:$0xff]  }
 0x288   :  { %v7352_v8 = vadd.f32 %v2889_v17, %v2837_v50  ;;  %v5560_v50 = vld [vmem:[%s7565_s5 + $0x98] sm:$0xff]   ;;  %v5561_v17 = vld [vmem:[%s7565_s5 + $0x90] sm:$0xff]  }
 0x289   :  { %3831 = vmatmul.mubr.bf16.vlgmr.msra.gmra.mxu0 %v3590_v25  ;;  %v2979_v61 = vpop.f32.mrf.mxu0  ;;  %v2833_v25 = vadd.f32 %v7322_v1, %v7330_v43  ;;  %v5563_v43 = vld [vmem:[%s7565_s5 + $0x80] sm:$0xff]  }
 0x28a   :  { %4979 = vmatpush3.bf16.msra.mxu0 %v5532_v7  ;;  %4119 = vmatprep.mubr.bf16.mxu0 %v3880_v26 }
 0x28b   :  { %4980 = vmatprep.subr.bf16.mxu0 %v5533_v4  ;;  %v2981_v41 = vpop.f32.mrf.mxu0  ;;  %v2874_v4 = vadd.f32 %v7291_v13, %v2821_v36 }
 0x28d   :  { %v2983_v42 = vpop.f32.mrf.mxu0 }
 0x28e   :  { %4981 = vmatpush3.bf16.msra.mxu0 %v5534_v29  ;;  %v2886_v29 = vadd.f32 %v7338_v38, %v2833_v25 }
 0x28f   :  { %4982 = vmatprep.subr.bf16.mxu0 %v5535_v56  ;;  %v2985_v3 = vpop.f32.mrf.mxu0 }
 0x291   :  { %v2989_v40 = vpop.f32.mrf.mxu0 }
 0x292   :  { %4983 = vmatpush3.bf16.msra.mxu0 %v5536_v39 }
 0x293   :  { %4984 = vmatprep.subr.bf16.mxu0 %v5537_v49  ;;  %v2991_v39 = vpop.f32.mrf.mxu0  ;;  %v5564_v49 = vld [vmem:[%s7565_s5 + $0xc0] sm:$0xff]  }
 0x296   :  { %4985 = vmatpush3.bf16.msra.mxu0 %v5538_v47 }
 0x297   :  { %4986 = vmatprep.subr.bf16.mxu0 %v5539_v20 }
 0x29a   :  { %4987 = vmatpush3.bf16.msra.mxu0 %v5540_v51  ;;  %v5565_v51 = vld [vmem:[%s7565_s5 + $0x248] sm:$0xff]  }
 0x29b   :  { %4988 = vmatprep.subr.bf16.mxu0 %v5541_v62 }
 0x29e   :  { %4989 = vmatpush3.bf16.msra.mxu0 %v5542_v0 }
 0x29f   :  { %4990 = vmatprep.subr.bf16.mxu0 %v5543_v6  ;;  %v5567_v6 = vld [vmem:[%s7565_s5 + $0x238] sm:$0xff]  }
 0x2a2   :  { %4991 = vmatpush3.bf16.msra.mxu0 %v5545_v52  ;;  %v5568_v52 = vld [vmem:[%s7565_s5 + $0x230] sm:$0xff]  }
 0x2a3   :  { %4992 = vmatprep.subr.bf16.mxu0 %v5546_v46 }
 0x2a6   :  { %4993 = vmatpush3.bf16.msra.mxu0 %v5548_v16  ;;  %v5570_v16 = vld [vmem:[%s7565_s5 + $0x220] sm:$0xff]  }
 0x2a9   :  { %4120 = vmatmul.mubr.bf16.vlgmr.msra.gmra.mxu0 %v3879_v30  ;;  %v5571_v30 = vld [vmem:[%s7565_s5 + $0x218] sm:$0xff]  }
 0x2b6   :  { %v2926_v33 = vpop.f32.mrf.mxu1 }
 0x2b7   :  { %v2927_v56 = vadd.f32 %v2926_v33, %v2874_v4 }
 0x2b8   :  { %v2928_v45 = vpop.f32.mrf.mxu1 }
 0x2b9   :  { %v2929_v32 = vadd.f32 %v2928_v45, %v2876_v23  ;;  %v2980_v13 = vadd.f32 %v2979_v61, %v2927_v56  ;;  %v2993_v61 = vpop.f32.mrf.mxu0  ;;  %v5573_v45 = vld [vmem:[%s7565_s5 + $0x250] sm:$0xff]   ;;  %v5585_v56 = vld [vmem:[%s7567_s7 + $0x20] sm:$0xff]  }
 0x2ba   :  { %v2930_v37 = vpop.f32.mrf.mxu1 }
 0x2bb   :  { %v2931_v24 = vadd.f32 %v2930_v37, %v2878_v34  ;;  %v2982_v54 = vadd.f32 %v2981_v41, %v2929_v32  ;;  %v3000_v47 = vmax.f32 %v2980_v13, 0.0  ;;  %v5572_v41 = vld [vmem:[%s7565_s5 + $0x210] sm:$0xff]   ;;  %v2995_v33 = vpop.f32.mrf.mxu0 }
 0x2bc   :  { %v2932_v12 = vpop.f32.mrf.mxu1 }
 0x2bd   :  { %v2984_v63 = vadd.f32 %v2983_v42, %v2931_v24  ;;  %v2933_v21 = vadd.f32 %v2932_v12, %v2880_v22  ;;  %v3001_v14 = vmax.f32 %v2982_v54, 0.0  ;;  %v3016_v62 = vpack.c.bf16 %v3000_v47, %v3000_v47  ;;  %v5574_v42 = vld [vmem:[%s7565_s5 + $0x310] sm:$0xff]  }
 0x2be   :  { %v2936_v7 = vpop.f32.mrf.mxu1  ;;  %v5587_v47 = vld [vmem:[%s7567_s7 + $0x10] sm:$0xff]  }
 0x2bf   :  { %v2986_v31 = vadd.f32 %v2985_v3, %v2933_v21  ;;  %v3004_v10 = vmax.f32 %v2984_v63, 0.0  ;;  %v3017_v55 = vpack.c.bf16 %v3001_v14, %v3001_v14  ;;  %v2937_v57 = vadd.f32 %v2936_v7, %v7332_v58  ;;  %v5575_v63 = vld [vmem:[%s7565_s5 + $0x308] sm:$0xff]   ;;  %v5576_v21 = vld [vmem:[%s7565_s5 + $0x300] sm:$0xff]   ;;  %v5577_v3 = vld [vmem:[%s7565_s5 + $0x2f8] sm:$0xff]  }
 0x2c0   :  { %v2938_v26 = vpop.f32.mrf.mxu1  ;;  %v5580_v14 = vld [vmem:[%s7565_s5 + $0x2e0] sm:$0xff]  }
 0x2c1   :  { %v3005_v18 = vmax.f32 %v2986_v31, 0.0  ;;  %v3070_v44 = vpack.c.bf16 %v3004_v10, %v3004_v10  ;;  %v2939_v1 = vadd.f32 %v2938_v26, %v2886_v29  ;;  %v2990_v23 = vadd.f32 %v2989_v40, %v2937_v57  ;;  %v5578_v31 = vld [vmem:[%s7565_s5 + $0x2f0] sm:$0xff]   ;;  %v5579_v10 = vld [vmem:[%s7565_s5 + $0x2e8] sm:$0xff]  }
 0x2c2   :  { %v2940_v46 = vpop.f32.mrf.mxu1  ;;  %v5595_v29 = vmov 0.0  }
 0x2c3   :  { %v3071_v53 = vpack.c.bf16 %v3005_v18, %v3005_v18  ;;  %v2992_v38 = vadd.f32 %v2991_v39, %v2939_v1  ;;  %v3008_v58 = vmax.f32 %v2990_v23, 0.0  ;;  %v2941_v18 = vadd.f32 %v2940_v46, %v7344_v11  ;;  %5008 = vmatprep.subr.bf16.mxu0 %v5595_v29  ;;  %v5586_v1 = vld [vmem:[%s7567_s7 + $0x18] sm:$0xff]   ;;  %5022 = vmatprep.mubr.msk.bf16.mxu0 %vm5596_vm4, %v5595_v29 }
 0x2c4   :  { %v2942_v59 = vpop.f32.mrf.mxu1 }
 0x2c5   :  { %4723 = vmatprep.mubr.msk.bf16.mxu1 %vm3273_vm2, %v3071_v53  ;;  %v3009_v20 = vmax.f32 %v2992_v38, 0.0  ;;  %v2943_v9 = vadd.f32 %v2942_v59, %v7352_v8  ;;  %v3592_v37 = vpack.c.bf16 %v3008_v58, %v3008_v58  ;;  %v5581_v53 = vld [vmem:[%s7565_s5 + $0x2d8] sm:$0xff]  }
 0x2c6   :  { %3350 = vmatmul.mubr.bf16.vlgmr.msra.gmra.mxu1 %v3070_v44 }
 0x2c7   :  { %3551 = vmatpush1.bf16.msra.mxu1 %v5556_v48  ;;  %4749 = vmatprep.mubr.msk.bf16.mxu1 %vm3273_vm2, %v3017_v55  ;;  %v3593_v0 = vpack.c.bf16 %v3009_v20, %v3009_v20  ;;  %v2996_v35 = vadd.f32 %v2995_v33, %v2943_v9  ;;  %v2994_v48 = vadd.f32 %v2993_v61, %v2941_v18  ;;  %v5588_v20 = vld [vmem:[%s7567_s7 + $0x8] sm:$0xff]  }
 0x2c8   :  { %3552 = vmatprep.subr.bf16.mxu1 %v7577_v15 }
 0x2c9   :  { %v3013_v34 = vmax.f32 %v2996_v35, 0.0 }
 0x2cb   :  { %3553 = vmatpush1.bf16.msra.mxu1 %v5557_v19  ;;  %v3882_v24 = vpack.c.bf16 %v3013_v34, %v3013_v34  ;;  %v5582_v19 = vld [vmem:[%s7565_s5 + $0x318] sm:$0xff]   ;;  %v4902_v34 = vld [vmem:[%s7568_s6] ss:$0 sm:$0xff] }
 0x2cc   :  { %3554 = vmatprep.subr.bf16.mxu1 %v7577_v15 }
 0x2cf   :  { %3555 = vmatpush1.bf16.msra.mxu1 %v5558_v27  ;;  %v3012_v27 = vmax.f32 %v2994_v48, 0.0 }
 0x2d0   :  { %3556 = vmatprep.subr.bf16.mxu1 %v7577_v15 }
 0x2d1   :  { %v3881_v36 = vpack.c.bf16 %v3012_v27, %v3012_v27 }
 0x2d3   :  { %3557 = vmatpush1.bf16.msra.mxu1 %v5559_v28 }
 0x2d4   :  { %3558 = vmatprep.subr.bf16.mxu1 %v7577_v15 }
 0x2d7   :  { %3559 = vmatpush1.bf16.msra.mxu1 %v5560_v50 }
 0x2d8   :  { %3560 = vmatprep.subr.bf16.mxu1 %v7577_v15 }
 0x2db   :  { %3561 = vmatpush1.bf16.msra.mxu1 %v5561_v17 }
 0x2dc   :  { %3562 = vmatprep.subr.bf16.mxu1 %v7577_v15 }
 0x2df   :  { %3563 = vmatpush1.bf16.msra.mxu1 %v5562_v2  ;;  %v5583_v2 = vld [vmem:[%s7567_s7 + $0x30] ss:$0 sps:$4 sm:$0x33]  }
 0x2e0   :  { %3564 = vmatprep.subr.bf16.mxu1 %v7577_v15  ;;  %v4243_v40 = vsel %vm4241_vm3, %v5583_v2, 0 }
 0x2e1   :  { %5009 = vmatpush3.bf16.msra.mxu0 %v4243_v40 }
 0x2e2   :  { %5010 = vmatprep.subr.bf16.mxu0 %v5595_v29 }
 0x2e3   :  { %3565 = vmatpush1.bf16.msra.mxu1 %v5563_v43 }
 0x2e4   :  { %3580 = vmatprep.subr.bf16.mxu1 %v7577_v15 }
 0x2e7   :  { %3581 = vmatpush2.bf16.msra.mxu1 %v5564_v49 }
 0x2e8   :  { %3838 = vmatprep.subr.bf16.mxu1 %v7577_v15 }
 0x2ea   :  { %3583 = vmatmul.mubr.bf16.vlgmr.msra.gmra.mxu1 %v3016_v62 }
 0x2eb   :  { %3839 = vmatpush1.bf16.msra.mxu1 %v5565_v51  ;;  %4825 = vmatprep.mubr.msk.bf16.mxu1 %vm3273_vm2, %v3593_v0  ;;  %v5589_v51 = vld [vmem:[%s7567_s7] sm:$0xff]  }
 0x2ec   :  { %3840 = vmatprep.subr.bf16.mxu1 %v7577_v15 }
 0x2ef   :  { %3841 = vmatpush1.bf16.msra.mxu1 %v5566_v60 }
 0x2f0   :  { %3842 = vmatprep.subr.bf16.mxu1 %v7577_v15 }
 0x2f3   :  { %3843 = vmatpush1.bf16.msra.mxu1 %v5567_v6 }
 0x2f4   :  { %3844 = vmatprep.subr.bf16.mxu1 %v7577_v15 }
 0x2f7   :  { %3845 = vmatpush1.bf16.msra.mxu1 %v5568_v52 }
 0x2f8   :  { %3846 = vmatprep.subr.bf16.mxu1 %v7577_v15 }
 0x2fb   :  { %3847 = vmatpush1.bf16.msra.mxu1 %v5569_v5 }
 0x2fc   :  { %3848 = vmatprep.subr.bf16.mxu1 %v7577_v15 }
 0x2ff   :  { %3849 = vmatpush1.bf16.msra.mxu1 %v5570_v16 }
 0x300   :  { %3850 = vmatprep.subr.bf16.mxu1 %v7577_v15 }
 0x303   :  { %3851 = vmatpush1.bf16.msra.mxu1 %v5571_v30 }
 0x304   :  { %3852 = vmatprep.subr.bf16.mxu1 %v7577_v15 }
 0x307   :  { %3853 = vmatpush1.bf16.msra.mxu1 %v5572_v41 }
 0x308   :  { %3868 = vmatprep.subr.bf16.mxu1 %v7577_v15 }
 0x309   :  { %v4928_v8 = vpop.f32.mrf.mxu0 }
 0x30b   :  { %3869 = vmatpush2.bf16.msra.mxu1 %v5573_v45  ;;  %v4929_v32 = vpop.f32.mrf.mxu0 }
 0x30c   :  { %v7490_v22 = vadd.f32 %v4929_v32, %v4928_v8  ;;  %4127 = vmatprep.subr.bf16.mxu1 %v7577_v15 }
 0x30d   :  { %v4931_v12 = vpop.f32.mrf.mxu0 }
 0x30e   :  { %3871 = vmatmul.mubr.bf16.vlgmr.msra.gmra.mxu1 %v3592_v37 }
 0x30f   :  { %4128 = vmatpush1.bf16.msra.mxu1 %v5574_v42  ;;  %4901 = vmatprep.mubr.msk.bf16.mxu1 %vm3273_vm2, %v3882_v24  ;;  %v4932_v54 = vpop.f32.mrf.mxu0 }
 0x310   :  { %4129 = vmatprep.subr.bf16.mxu1 %v7577_v15  ;;  %v4903_v54 = vld [vmem:[%s7569_s8] ss:$0 sm:$0xff] }
 0x313   :  { %4130 = vmatpush1.bf16.msra.mxu1 %v5575_v63 }
 0x314   :  { %4131 = vmatprep.subr.bf16.mxu1 %v7577_v15 }
 0x317   :  { %4132 = vmatpush1.bf16.msra.mxu1 %v5576_v21 }
 0x318   :  { %4133 = vmatprep.subr.bf16.mxu1 %v7577_v15 }
 0x31b   :  { %4134 = vmatpush1.bf16.msra.mxu1 %v5577_v3 }
 0x31c   :  { %4135 = vmatprep.subr.bf16.mxu1 %v7577_v15 }
 0x31f   :  { %4136 = vmatpush1.bf16.msra.mxu1 %v5578_v31 }
 0x320   :  { %4137 = vmatprep.subr.bf16.mxu1 %v7577_v15 }
 0x323   :  { %4138 = vmatpush1.bf16.msra.mxu1 %v5579_v10 }
 0x324   :  { %4139 = vmatprep.subr.bf16.mxu1 %v7577_v15 }
 0x327   :  { %4140 = vmatpush1.bf16.msra.mxu1 %v5580_v14 }
 0x328   :  { %4141 = vmatprep.subr.bf16.mxu1 %v7577_v15 }
 0x329   :  { %v4950_v44 = vpop.f32.mrf.mxu0 }
 0x32b   :  { %4142 = vmatpush1.bf16.msra.mxu1 %v5581_v53  ;;  %v4951_v55 = vpop.f32.mrf.mxu0 }
 0x32c   :  { %v4952_v28 = vadd.f32 %v4951_v55, %v4950_v44  ;;  %4157 = vmatprep.subr.bf16.mxu1 %v7577_v15  ;;  %v5584_v15 = vld [vmem:[%s7567_s7 + $0x28] sm:$0xff]  }
 0x32d   :  { %v4953_v11 = vpop.f32.mrf.mxu0  ;;  %5011 = vmatpush3.bf16.msra.mxu0 %v5584_v15 }
 0x32e   :  { %5012 = vmatprep.subr.bf16.mxu0 %v5595_v29 }
 0x32f   :  { %4158 = vmatpush2.bf16.msra.mxu1 %v5582_v19  ;;  %v4954_v50 = vpop.f32.mrf.mxu0 }
 0x331   :  { %5013 = vmatpush3.bf16.msra.mxu0 %v5585_v56 }
 0x332   :  { %4160 = vmatmul.mubr.bf16.vlgmr.msra.gmra.mxu1 %v3881_v36  ;;  %5014 = vmatprep.subr.bf16.mxu0 %v5595_v29 }
 0x335   :  { %5015 = vmatpush3.bf16.msra.mxu0 %v5586_v1 }
 0x336   :  { %5016 = vmatprep.subr.bf16.mxu0 %v5595_v29 }
 0x339   :  { %5017 = vmatpush3.bf16.msra.mxu0 %v5587_v47 }
 0x33a   :  { %5018 = vmatprep.subr.bf16.mxu0 %v5595_v29 }
 0x33d   :  { %5019 = vmatpush3.bf16.msra.mxu0 %v5588_v20 }
 0x33e   :  { %5020 = vmatprep.subr.bf16.mxu0 %v5595_v29 }
 0x341   :  { %5021 = vmatpush3.bf16.msra.mxu0 %v5589_v51 }
 0x349   :  { %v4972_v7 = vpop.f32.mrf.mxu0 }
 0x34b   :  { %v4973_v25 = vpop.f32.mrf.mxu0 }
 0x34c   :  { %v4974_v17 = vadd.f32 %v4973_v25, %v4972_v7 }
 0x34d   :  { %v4975_v4 = vpop.f32.mrf.mxu0 }
 0x34f   :  { %v4976_v26 = vpop.f32.mrf.mxu0 }
 0x369   :  { %v4994_v43 = vpop.f32.mrf.mxu0 }
 0x36b   :  { %v4995_v39 = vpop.f32.mrf.mxu0 }
 0x36c   :  { %v4996_v13 = vadd.f32 %v4995_v39, %v4994_v43 }
 0x36d   :  { %v4997_v38 = vpop.f32.mrf.mxu0 }
 0x36f   :  { %v4998_v49 = vpop.f32.mrf.mxu0 }
 0x386   :  { %v3351_v62 = vpop.f32.mrf.mxu1 }
 0x387   :  { %v3352_v0 = vadd.f32 %v7490_v22, %v3351_v62 }
 0x388   :  { %v3353_v60 = vpop.f32.mrf.mxu1 }
 0x389   :  { %v3545_v6 = vadd.f32 %v4952_v28, %v3352_v0 }
 0x38a   :  { %v3354_v52 = vpop.f32.mrf.mxu1 }
 0x38c   :  { %v3355_v5 = vpop.f32.mrf.mxu1 }
 0x3aa   :  { %v3584_v46 = vpop.f32.mrf.mxu1 }
 0x3ab   :  { %v3585_v16 = vadd.f32 %v3584_v46, %v3545_v6 }
 0x3ac   :  { %v3586_v59 = vpop.f32.mrf.mxu1 }
 0x3ae   :  { %v3587_v30 = vpop.f32.mrf.mxu1 }
 0x3b0   :  { %v3588_v61 = vpop.f32.mrf.mxu1 }
 0x3ce   :  { %v3872_v57 = vpop.f32.mrf.mxu1 }
 0x3cf   :  { %v3873_v9 = vadd.f32 %v4974_v17, %v3872_v57 }
 0x3d0   :  { %v3874_v41 = vpop.f32.mrf.mxu1 }
 0x3d1   :  { %v3878_v33 = vadd.f32 %v3873_v9, %v3585_v16 }
 0x3d2   :  { %v3875_v23 = vpop.f32.mrf.mxu1 }
 0x3d4   :  { %v3876_v35 = vpop.f32.mrf.mxu1 }
 0x3f2   :  { %v4161_v45 = vpop.f32.mrf.mxu1 }
 0x3f3   :  { %v4162_v58 = vadd.f32 %v4996_v13, %v4161_v45 }
 0x3f4   :  { %v4163_v8 = vpop.f32.mrf.mxu1 }
 0x3f5   :  { %v4167_v32 = vadd.f32 %v4162_v58, %v3878_v33 }
 0x3f6   :  { %v4164_v42 = vpop.f32.mrf.mxu1 }
 0x3f7   :  { %v4175_v37 = vadd.f32 %v4902_v34, %v4167_v32 }
 0x3f8   :  { %v4165_v22 = vpop.f32.mrf.mxu1 }
 0x3f9   :  { %v4176_v24 = vmax.f32 %v4175_v37, 0.0 }
 0x3fb   :  { %v4177_v12 = vpack.c.bf16 %v4176_v24, %v4176_v24 }
 0x3fd   :  { %5023 = vmatmul.mubr.msk.bf16.vlgmr.msra.gmra.mxu0 %vm4237_vm5, %v4177_v12 }
 0x4bd   :  { %v4279_v63 = vpop.f32.mrf.mxu0 }
 0x4be   :  { %v4280_v21 = vadd.f32 %v4903_v54, %v4279_v63 }
 0x4bf   :  { %v5024_v3 = vpop.f32.mrf.mxu0 }
 0x4c0   :  { %v4285_v31 = vmax.f32 %v4280_v21, 0.0 }
 0x4c1   :  { %v4282_v10 = vpop.f32.mrf.mxu0 }
 0x4c2   :  { %v4287_v14 = vsel %vm4286_vm6, %v4285_v31, -inf }
 0x4c3   :  { %4288 = vmax.xlane.f32.xlu0 %v4287_v14  ;;  %v5025_v18 = vpop.f32.mrf.mxu0 }
 0x54c   :  { %v4289_v53 = vpop.xlane.xlu0 %4288 }
 0x54d   :  { %v4290_v48 = vsub.f32 %v4285_v31, %v4289_v53 }
 0x54f   :  { %v4291_v44 = vmul.f32 1.442695, %v4290_v48 }
 0x551   :  { %5590 = vpow2.f32 %v4291_v44 }
 0x55e   :  { %v5591_v55 = vpop.eup %5590 }
 0x55f   :  { %v4293_v19 = vsel %vm4286_vm6, %v5591_v55, 0.0 }
 0x560   :  { %4294 = vadd.xlane.f32.xlu0 %v4293_v19 }
 0x5e9   :  { %v4295_v27 = vpop.xlane.xlu0 %4294 }
 0x5ea   :  { %5592 = vlog2.f32 %v4295_v27 }
 0x5f7   :  { %v5593_v28 = vpop.eup %5592 }
 0x5f8   :  { %v4297_v11 = vmul.f32 0.6931472, %v5593_v28 }
 0x5fa   :  { %v4298_v50 = vadd.f32 %v4297_v11, %v4289_v53 }
 0x5fc   :  { %v4299_v36 = vsub.f32 %v4285_v31, %v4298_v50 }
 0x5fe   :  { %4300 = vst.msk [vmem:[%s7570_s9] sm:$0xff] %vm4286_vm6, %v4299_v36 }

</bundles_post_ra>
